<compile_context>
chip_gen: v6e
topology: v6e:2x2x1
jax: 0.10.0
libtpu: 0.0.40
codegen_flags: <defaults>
</compile_context>

<pallas_src>
import functools

import jax
import jax.numpy as jnp
from jax.experimental import pallas as pl
from jax.experimental.pallas import tpu as pltpu


# ---------------------------------------------------------------------------------------
# Kernel
# ---------------------------------------------------------------------------------------
def _transformer_block_kernel(
    x_ref,          # (block_b, S, E)  input dtype (f32)
    w_in_ref,       # (E, 3E)          in_proj_weight.T, Q rows pre-scaled by 1/sqrt(hd)
    b_in_ref,       # (1, 3E)          f32, Q part pre-scaled
    wo_heads_ref,   # (H, hd, E)       out_proj.weight.T reshaped per head
    b_out_ref,      # (1, E)           f32
    w1_ref,         # (E, Hm)          mlp[0].weight.T
    b1_ref,         # (1, Hm)          f32
    w2_ref,         # (Hm, E)          mlp[2].weight.T
    b2_ref,         # (1, E)           f32
    o_ref,          # (block_b, S, E)
    *,
    num_heads: int,
    block_b: int,
    seq_len: int,
    embed_dim: int,
    compute_dtype,
    bf16_softmax: bool,
    head_batched_4d: bool,
):
    H, S, E = num_heads, seq_len, embed_dim
    hd = E // H
    M = block_b * S
    cd = compute_dtype
    is_f32 = jnp.dtype(cd) == jnp.dtype(jnp.float32)

    # Residual path stays f32; bf16 copies are created inline at each dot site only.
    x_f32 = x_ref[...].reshape(M, E).astype(jnp.float32)

    # --- fused QKV projection: (M, E) @ (E, 3E) + b, f32 accumulation ---
    qkv = (
        jnp.dot(x_f32.astype(cd), w_in_ref[...], preferred_element_type=jnp.float32)
        + b_in_ref[...]
    )
    q_all = qkv[:, 0 * E:1 * E].astype(cd)   # already scaled by 1/sqrt(hd) via the weights
    k_all = qkv[:, 1 * E:2 * E].astype(cd)
    v_all = qkv[:, 2 * E:3 * E].astype(cd)

    if head_batched_4d:
        # ONE reshape per tensor puts heads on their own axis; no slab loops / stacks.
        q = q_all.reshape(block_b, S, H, hd)
        k = k_all.reshape(block_b, S, H, hd)
        v = v_all.reshape(block_b, S, H, hd)
        # batched over (batch row, head); natural dot_general output order 'bhqk'.
        s = jnp.einsum("bqhd,bkhd->bhqk", q, k,
                       preferred_element_type=jnp.float32)          # (b, H, S, S) f32
    else:
        # Conservative fallback: single leading batch axis (H*block_b, S, hd) built from
        # H lane slices per tensor (previously validated lowering).
        def to_heads(t):  # (M, E) -> (H*block_b, S, hd); batch index = h*block_b + b
            return jnp.stack(
                [t[:, h * hd:(h + 1) * hd] for h in range(H)], axis=0
            ).reshape(H * block_b, S, hd)

        q = to_heads(q_all)
        k = to_heads(k_all)
        v = to_heads(v_all)
        s = jnp.einsum("bqd,bkd->bqk", q, k,
                       preferred_element_type=jnp.float32)          # (H*b, S, S) f32

    # --- numerically stable softmax with deferred normalization ---
    m = jnp.max(s, axis=-1, keepdims=True)
    if bf16_softmax and not is_f32:
        # bf16 EUP/VPU path (v6e/v7x): probabilities in bf16, row-sum in f32.
        p_c = jnp.exp((s - m).astype(cd))
        l = jnp.sum(p_c.astype(jnp.float32), axis=-1, keepdims=True)
    else:
        p = jnp.exp(s - m)
        l = jnp.sum(p, axis=-1, keepdims=True)
        p_c = p.astype(cd)
    # NOTE: approx reciprocal (EUP) only on the bf16 path; exact divide on the f32 path.
    inv_l = pl.reciprocal(l, approx=not is_f32)

    if head_batched_4d:
        o = jnp.einsum("bhqk,bkhd->bhqd", p_c, v,
                       preferred_element_type=jnp.float32) * inv_l  # (b, H, S, hd) f32
        # Output projection: ONE contraction over (h, d) => K = E, heads never concat'ed.
        attn = jnp.einsum("bhqd,hde->bqe", o.astype(cd), wo_heads_ref[...],
                          preferred_element_type=jnp.float32).reshape(M, E)
    else:
        o = jnp.einsum("bqk,bkd->bqd", p_c, v,
                       preferred_element_type=jnp.float32) * inv_l  # (H*b, S, hd) f32
        o_heads = o.astype(cd).reshape(H, M, hd)
        attn = jnp.dot(o_heads[0], wo_heads_ref[0], preferred_element_type=jnp.float32)
        for h in range(1, H):
            attn = attn + jnp.dot(o_heads[h], wo_heads_ref[h],
                                  preferred_element_type=jnp.float32)

    x1 = x_f32 + attn + b_out_ref[...]                              # (M, E) f32

    # --- MLP: Linear -> Tanh -> Linear, then residual ---
    h1 = jnp.tanh(
        jnp.dot(x1.astype(cd), w1_ref[...], preferred_element_type=jnp.float32)
        + b1_ref[...]
    )
    mlp_out = (
        jnp.dot(h1.astype(cd), w2_ref[...], preferred_element_type=jnp.float32)
        + b2_ref[...]
    )
    o_ref[...] = (x1 + mlp_out).reshape(block_b, S, E).astype(o_ref.dtype)


# ---------------------------------------------------------------------------------------
# Hardware queries / VMEM budgeting
# ---------------------------------------------------------------------------------------
def _device_kind():
    try:
        return jax.devices()[0].device_kind.lower()
    except Exception:
        return ""


def _vmem_capacity_bytes():
    try:
        cap = int(pltpu.get_tpu_info().vmem_capacity_bytes)
        if cap > 0:
            return cap
    except Exception:
        pass
    return 64 * 1024 * 1024   # conservative (v7x-sized) fallback


def _estimate_vmem_bytes(block_b, S, E, Hm, H, cd_bytes, p_bytes):
    """Rough per-grid-step VMEM working set (conservatively double-buffered weights)."""
    f32 = 4
    M = block_b * S
    weights = 2 * cd_bytes * (4 * E * E + 2 * E * Hm)
    biases = 2 * f32 * (5 * E + Hm)
    io_tiles = 2 * 2 * M * E * f32                       # x & out blocks, double-buffered
    qkv = f32 * M * 3 * E + cd_bytes * 3 * M * E         # qkv f32 + q/k/v compute dtype
    scores = block_b * H * S * S * (f32 + p_bytes)       # s + p  (O(S^2) term)
    epilogue = f32 * M * (3 * E + Hm)                    # x_f32/x1, attn, h1/mlp
    return weights + biases + io_tiles + qkv + scores + epilogue


def _pick_block_b(B, S, E, Hm, H, cd_bytes, p_bytes, vmem_limit, prefer_two_steps,
                  max_rows=2048):
    """Largest divisor of B whose working set fits the VMEM budget; keeps >= 2 grid steps
    only on multi-TensorCore chips (v7x)."""
    best = 1
    for d in range(1, B + 1):
        if B % d:
            continue
        if prefer_two_steps and d > 1 and B // d < 2:
            continue
        if d * S > max_rows:
            continue
        if _estimate_vmem_bytes(d, S, E, Hm, H, cd_bytes, p_bytes) > 0.7 * vmem_limit:
            continue
        best = d
    return best


# ---------------------------------------------------------------------------------------
# pallas_call builder + wrapper
# ---------------------------------------------------------------------------------------
def _build_call(*, B, S, E, H, Hm, block_b, out_dtype, compute_dtype, bf16_softmax,
                head_batched_4d, single_buffer_weights, vmem_limit):
    hd = E // H
    kernel = functools.partial(
        _transformer_block_kernel,
        num_heads=H, block_b=block_b, seq_len=S, embed_dim=E,
        compute_dtype=compute_dtype, bf16_softmax=bf16_softmax,
        head_batched_4d=head_batched_4d)

    # Constant-index weight/bias blocks are never re-fetched: request single buffering.
    wkw = dict(pipeline_mode=pl.Buffered(1)) if single_buffer_weights else {}

    def wspec(shape):
        return pl.BlockSpec(shape, lambda b: (0,) * len(shape), **wkw)

    return pl.pallas_call(
        kernel,
        out_shape=jax.ShapeDtypeStruct((B, S, E), out_dtype),
        grid_spec=pltpu.PrefetchScalarGridSpec(
            num_scalar_prefetch=0,
            grid=(B // block_b,),
            in_specs=[
                pl.BlockSpec((block_b, S, E), lambda b: (b, 0, 0)),  # x (batch tile)
                wspec((E, 3 * E)),            # in_proj_weight.T (scale folded in)
                wspec((1, 3 * E)),            # in_proj_bias
                wspec((H, hd, E)),            # out_proj.weight.T per head
                wspec((1, E)),                # out_proj.bias
                wspec((E, Hm)),               # mlp[0].weight.T
                wspec((1, Hm)),               # mlp[0].bias
                wspec((Hm, E)),               # mlp[2].weight.T
                wspec((1, E)),                # mlp[2].bias
            ],
            out_specs=pl.BlockSpec((block_b, S, E), lambda b: (b, 0, 0)),
        ),
        compiler_params=pltpu.CompilerParams(
            dimension_semantics=("parallel",),
            vmem_limit_bytes=int(vmem_limit),
        ),
    )


# (head_batched_4d, single_buffer_weights) configs, most aggressive first.
_CONFIGS = ((True, True), (True, False), (False, True), (False, False))
_WORKING_CONFIG_IDX = [None]


def transformer_block(x, params, *, num_heads,
                      compute_dtype=jnp.bfloat16, block_b=None):
    """x: (B, S, E) float32.  params use PyTorch nn.MultiheadAttention / nn.Linear layouts."""
    B, S, E = x.shape
    assert E % num_heads == 0
    hd = E // num_heads
    Hm = params["w1"].shape[0]

    cd = jnp.dtype(compute_dtype)
    is_f32_compute = cd == jnp.dtype(jnp.float32)

    kind = _device_kind()
    vmem_cap = _vmem_capacity_bytes()
    # ~56 MiB on 64 MiB chips (v7x), ~110 MiB on 128 MiB chips (v5e/v6e).
    vmem_limit = max(32 * 1024 * 1024, min((vmem_cap * 7) // 8, 110 * 1024 * 1024))
    # bf16 softmax elementwise only where the VPU/EUP have bf16 datapaths (v6e/v7x).
    bf16_softmax = (not is_f32_compute) and ("v6" in kind or "v7" in kind)
    multi_tc = "v7" in kind   # 2 TensorCores per chip -> keep >= 2 grid steps

    cd_bytes = cd.itemsize
    p_bytes = cd_bytes if bf16_softmax else 4
    if block_b is None:
        block_b = _pick_block_b(B, S, E, Hm, num_heads, cd_bytes, p_bytes,
                                vmem_limit, multi_tc)
    assert B % block_b == 0

    # Wrapper-side layout plumbing (one-time XLA cost): pre-transpose everything, fold the
    # attention scale into the Q rows, reshape out_proj per head, optionally cast weights
    # to bf16.  Biases stay f32 (added after f32 accumulation).
    scale = 1.0 / (hd ** 0.5)
    w_in = jnp.asarray(params["w_in"], jnp.float32).at[:E].multiply(scale)
    b_in = jnp.asarray(params["b_in"], jnp.float32).at[:, :E].multiply(scale)
    w_in_t = w_in.T.astype(cd)                                              # (E, 3E)
    wo_heads = (jnp.asarray(params["w_out"], jnp.float32).T
                .reshape(num_heads, hd, E).astype(cd))                      # (H, hd, E)
    w1_t = jnp.asarray(params["w1"], jnp.float32).T.astype(cd)              # (E, Hm)
    w2_t = jnp.asarray(params["w2"], jnp.float32).T.astype(cd)              # (Hm, E)
    b_out = jnp.asarray(params["b_out"], jnp.float32)
    b1 = jnp.asarray(params["b1"], jnp.float32)
    b2 = jnp.asarray(params["b2"], jnp.float32)
    args = (x, w_in_t, b_in, wo_heads, b_out, w1_t, b1, w2_t, b2)

    # Try the most aggressive lowering first; fall back to conservative variants if the
    # installed Mosaic version rejects multi-batch-dim einsums or Buffered(1) blocks.
    # (Fallback selection only works when this wrapper is called eagerly.)
    order = list(range(len(_CONFIGS)))
    if _WORKING_CONFIG_IDX[0] is not None:
        i0 = _WORKING_CONFIG_IDX[0]
        order = [i0] + [i for i in order if i != i0]

    last_err = None
    for idx in order:
        use_4d, sbuf = _CONFIGS[idx]
        try:
            call = _build_call(
                B=B, S=S, E=E, H=num_heads, Hm=Hm, block_b=block_b,
                out_dtype=x.dtype, compute_dtype=cd, bf16_softmax=bf16_softmax,
                head_batched_4d=use_4d, single_buffer_weights=sbuf,
                vmem_limit=vmem_limit)
            out = call(*args)
            if hasattr(out, "block_until_ready"):
                out.block_until_ready()   # surface compile/runtime errors inside the try
            _WORKING_CONFIG_IDX[0] = idx
            return out
        except Exception as e:  # fall back to a more conservative lowering config
            last_err = e
    raise last_err


# ---------------------------------------------------------------------------------------
# Pure-JAX reference (PyTorch nn.MultiheadAttention + MLP semantics)
# ---------------------------------------------------------------------------------------
def _reference(x, params, num_heads):
    B, S, E = x.shape
    hd = E // num_heads
    hp = jax.lax.Precision.HIGHEST
    qkv = jnp.einsum("bse,fe->bsf", x, params["w_in"], precision=hp) + params["b_in"][0]
    q, k, v = qkv[..., :E], qkv[..., E:2 * E], qkv[..., 2 * E:]

    def split(t):  # (B, S, E) -> (B, H, S, hd)
        return t.reshape(B, S, num_heads, hd).transpose(0, 2, 1, 3)

    q, k, v = split(q) / (hd ** 0.5), split(k), split(v)
    s = jnp.einsum("bhqd,bhkd->bhqk", q, k, precision=hp)
    p = jax.nn.softmax(s, axis=-1)
    a = jnp.einsum("bhqk,bhkd->bhqd", p, v, precision=hp).transpose(0, 2, 1, 3)
    a = a.reshape(B, S, E)
    attn_out = jnp.einsum("bse,fe->bsf", a, params["w_out"], precision=hp) + params["b_out"][0]
    x1 = x + attn_out
    h1 = jnp.tanh(jnp.einsum("bse,fe->bsf", x1, params["w1"], precision=hp) + params["b1"][0])
    mlp_out = jnp.einsum("bsh,fh->bsf", h1, params["w2"], precision=hp) + params["b2"][0]
    return x1 + mlp_out


# ---------------------------------------------------------------------------------------
# Self-test
# ---------------------------------------------------------------------------------------
if __name__ == "__main__":
    def _init(key, shape, fan_in):
        bound = 1.0 / (fan_in ** 0.5)
        return jax.random.uniform(key, shape, jnp.float32, -bound, bound)

    def _make_params(key, E, Hm):
        ks = jax.random.split(key, 8)
        return {
            "w_in":  _init(ks[0], (3 * E, E), E),
            "b_in":  _init(ks[1], (1, 3 * E), E),
            "w_out": _init(ks[2], (E, E), E),
            "b_out": _init(ks[3], (1, E), E),
            "w1":    _init(ks[4], (Hm, E), E),
            "b1":    _init(ks[5], (1, Hm), E),
            "w2":    _init(ks[6], (E, Hm), Hm),
            "b2":    _init(ks[7], (1, E), Hm),
        }

    def _run_case(seed, B, S, E, H, mlp_ratio, f32_tol, bf16_atol):
        Hm = int(E * mlp_ratio)
        kx, kp = jax.random.split(jax.random.PRNGKey(seed))
        x = jax.random.normal(kx, (B, S, E), jnp.float32)
        params = _make_params(kp, E, Hm)
        ref = _reference(x, params, H)

        # Strict check: f32 compute path must match the PyTorch-style reference tightly.
        out32 = jax.block_until_ready(
            transformer_block(x, params, num_heads=H, compute_dtype=jnp.float32))
        assert out32.shape == (B, S, E)
        err32 = float(jnp.max(jnp.abs(out32 - ref)))
        assert jnp.allclose(out32, ref, atol=f32_tol, rtol=f32_tol), (
            f"f32 mismatch (B={B},S={S},E={E},H={H}): max_err={err32}")

        # Performance path: bf16 MXU inputs with f32 accumulation (looser tolerance).
        outbf = jax.block_until_ready(
            transformer_block(x, params, num_heads=H, compute_dtype=jnp.bfloat16))
        assert outbf.shape == (B, S, E)
        errbf = float(jnp.max(jnp.abs(outbf - ref)))
        assert jnp.allclose(outbf, ref, atol=bf16_atol, rtol=bf16_atol), (
            f"bf16 mismatch (B={B},S={S},E={E},H={H}): max_err={errbf}")

    # Small shape consistent with the module: batch=2, seq=8, embed_dim=32, heads=4, ratio=1.
    _run_case(0, B=2, S=8, E=32, H=4, mlp_ratio=1, f32_tol=1e-4, bf16_atol=5e-2)
    # (8,128)-aligned shape so the lane-dense / head-relayout paths are exercised too.
    _run_case(1, B=2, S=128, E=256, H=4, mlp_ratio=2, f32_tol=1e-3, bf16_atol=5e-2)

    print("KERNEL_OK")
</pallas_src>

<mosaic_0001>
module attributes {stable_mosaic.version = 11 : i64} {
  func.func @_transformer_block_kernel(%arg0: i32, %arg1: memref<2x8x32xf32, #tpu.memory_space<vmem>>, %arg2: memref<32x96xf32, #tpu.memory_space<vmem>>, %arg3: memref<1x96xf32, #tpu.memory_space<vmem>>, %arg4: memref<4x8x32xf32, #tpu.memory_space<vmem>>, %arg5: memref<1x32xf32, #tpu.memory_space<vmem>>, %arg6: memref<32x32xf32, #tpu.memory_space<vmem>>, %arg7: memref<1x32xf32, #tpu.memory_space<vmem>>, %arg8: memref<32x32xf32, #tpu.memory_space<vmem>>, %arg9: memref<1x32xf32, #tpu.memory_space<vmem>>, %arg10: memref<2x8x32xf32, #tpu.memory_space<vmem>>) attributes {dimension_semantics = [#tpu.dimension_semantics<parallel>], iteration_bounds = array<i64: 1>, scalar_prefetch = 0 : i64, scratch_operands = 0 : i64, tpu.core_type = #tpu.core_type<tc>, window_params = [{transform_indices = @transform_0, window_bounds = array<i64: 2, 8, 32>}, {pipeline_mode = #tpu.pipeline_mode<synchronous>, transform_indices = @transform_1, window_bounds = array<i64: 32, 96>}, {pipeline_mode = #tpu.pipeline_mode<synchronous>, transform_indices = @transform_2, window_bounds = array<i64: 1, 96>}, {pipeline_mode = #tpu.pipeline_mode<synchronous>, transform_indices = @transform_3, window_bounds = array<i64: 4, 8, 32>}, {pipeline_mode = #tpu.pipeline_mode<synchronous>, transform_indices = @transform_4, window_bounds = array<i64: 1, 32>}, {pipeline_mode = #tpu.pipeline_mode<synchronous>, transform_indices = @transform_5, window_bounds = array<i64: 32, 32>}, {pipeline_mode = #tpu.pipeline_mode<synchronous>, transform_indices = @transform_6, window_bounds = array<i64: 1, 32>}, {pipeline_mode = #tpu.pipeline_mode<synchronous>, transform_indices = @transform_7, window_bounds = array<i64: 32, 32>}, {pipeline_mode = #tpu.pipeline_mode<synchronous>, transform_indices = @transform_8, window_bounds = array<i64: 1, 32>}, {transform_indices = @transform_9, window_bounds = array<i64: 2, 8, 32>}]} {
    %c0 = arith.constant 0 : index
    %c0_0 = arith.constant 0 : index
    %c0_1 = arith.constant 0 : index
    %0 = vector.load %arg1[%c0, %c0_0, %c0_1] : memref<2x8x32xf32, #tpu.memory_space<vmem>>, vector<2x8x32xf32>
    %1 = vector.shape_cast %0 : vector<2x8x32xf32> to vector<16x32xf32>
    %c0_2 = arith.constant 0 : index
    %c0_3 = arith.constant 0 : index
    %2 = vector.load %arg2[%c0_2, %c0_3] : memref<32x96xf32, #tpu.memory_space<vmem>>, vector<32x96xf32>
    %cst = arith.constant dense<0.000000e+00> : vector<16x96xf32>
    %3 = tpu.matmul %1, %2, %cst {dimension_numbers = #tpu.dot_dimension_numbers<[1], [0], [0], [1], [0, 0, 1, 1], [], []>} : vector<16x32xf32>, vector<32x96xf32>, vector<16x96xf32> -> vector<16x96xf32>
    %c0_4 = arith.constant 0 : index
    %c0_5 = arith.constant 0 : index
    %4 = vector.load %arg3[%c0_4, %c0_5] : memref<1x96xf32, #tpu.memory_space<vmem>>, vector<1x96xf32>
    %5 = vector.broadcast %4 : vector<1x96xf32> to vector<16x96xf32>
    %6 = arith.addf %3, %5 : vector<16x96xf32>
    %7 = vector.extract_strided_slice %6 {offsets = [0, 0], sizes = [16, 32], strides = [1, 1]} : vector<16x96xf32> to vector<16x32xf32>
    %8 = vector.extract_strided_slice %6 {offsets = [0, 32], sizes = [16, 32], strides = [1, 1]} : vector<16x96xf32> to vector<16x32xf32>
    %9 = vector.extract_strided_slice %6 {offsets = [0, 64], sizes = [16, 32], strides = [1, 1]} : vector<16x96xf32> to vector<16x32xf32>
    %10 = vector.extract_strided_slice %7 {offsets = [0, 0], sizes = [16, 8], strides = [1, 1]} : vector<16x32xf32> to vector<16x8xf32>
    %11 = vector.extract_strided_slice %7 {offsets = [0, 8], sizes = [16, 8], strides = [1, 1]} : vector<16x32xf32> to vector<16x8xf32>
    %12 = vector.extract_strided_slice %7 {offsets = [0, 16], sizes = [16, 8], strides = [1, 1]} : vector<16x32xf32> to vector<16x8xf32>
    %13 = vector.extract_strided_slice %7 {offsets = [0, 24], sizes = [16, 8], strides = [1, 1]} : vector<16x32xf32> to vector<16x8xf32>
    %14 = vector.shape_cast %10 : vector<16x8xf32> to vector<1x16x8xf32>
    %15 = vector.shape_cast %11 : vector<16x8xf32> to vector<1x16x8xf32>
    %16 = vector.shape_cast %12 : vector<16x8xf32> to vector<1x16x8xf32>
    %17 = vector.shape_cast %13 : vector<16x8xf32> to vector<1x16x8xf32>
    %18 = tpu.concatenate %14, %15, %16, %17 in 0 : vector<1x16x8xf32>, vector<1x16x8xf32>, vector<1x16x8xf32>, vector<1x16x8xf32> -> vector<4x16x8xf32>
    %19 = vector.shape_cast %18 : vector<4x16x8xf32> to vector<8x8x8xf32>
    %20 = vector.extract_strided_slice %8 {offsets = [0, 0], sizes = [16, 8], strides = [1, 1]} : vector<16x32xf32> to vector<16x8xf32>
    %21 = vector.extract_strided_slice %8 {offsets = [0, 8], sizes = [16, 8], strides = [1, 1]} : vector<16x32xf32> to vector<16x8xf32>
    %22 = vector.extract_strided_slice %8 {offsets = [0, 16], sizes = [16, 8], strides = [1, 1]} : vector<16x32xf32> to vector<16x8xf32>
    %23 = vector.extract_strided_slice %8 {offsets = [0, 24], sizes = [16, 8], strides = [1, 1]} : vector<16x32xf32> to vector<16x8xf32>
    %24 = vector.shape_cast %20 : vector<16x8xf32> to vector<1x16x8xf32>
    %25 = vector.shape_cast %21 : vector<16x8xf32> to vector<1x16x8xf32>
    %26 = vector.shape_cast %22 : vector<16x8xf32> to vector<1x16x8xf32>
    %27 = vector.shape_cast %23 : vector<16x8xf32> to vector<1x16x8xf32>
    %28 = tpu.concatenate %24, %25, %26, %27 in 0 : vector<1x16x8xf32>, vector<1x16x8xf32>, vector<1x16x8xf32>, vector<1x16x8xf32> -> vector<4x16x8xf32>
    %29 = vector.shape_cast %28 : vector<4x16x8xf32> to vector<8x8x8xf32>
    %30 = vector.extract_strided_slice %9 {offsets = [0, 0], sizes = [16, 8], strides = [1, 1]} : vector<16x32xf32> to vector<16x8xf32>
    %31 = vector.extract_strided_slice %9 {offsets = [0, 8], sizes = [16, 8], strides = [1, 1]} : vector<16x32xf32> to vector<16x8xf32>
    %32 = vector.extract_strided_slice %9 {offsets = [0, 16], sizes = [16, 8], strides = [1, 1]} : vector<16x32xf32> to vector<16x8xf32>
    %33 = vector.extract_strided_slice %9 {offsets = [0, 24], sizes = [16, 8], strides = [1, 1]} : vector<16x32xf32> to vector<16x8xf32>
    %34 = vector.shape_cast %30 : vector<16x8xf32> to vector<1x16x8xf32>
    %35 = vector.shape_cast %31 : vector<16x8xf32> to vector<1x16x8xf32>
    %36 = vector.shape_cast %32 : vector<16x8xf32> to vector<1x16x8xf32>
    %37 = vector.shape_cast %33 : vector<16x8xf32> to vector<1x16x8xf32>
    %38 = tpu.concatenate %34, %35, %36, %37 in 0 : vector<1x16x8xf32>, vector<1x16x8xf32>, vector<1x16x8xf32>, vector<1x16x8xf32> -> vector<4x16x8xf32>
    %39 = vector.shape_cast %38 : vector<4x16x8xf32> to vector<8x8x8xf32>
    "tpu.trace_start"() <{level = 10 : i32, message = "bqd,bkd->bqk"}> : () -> ()
    %cst_6 = arith.constant dense<0.000000e+00> : vector<8x8x8xf32>
    %40 = tpu.matmul %19, %29, %cst_6 {dimension_numbers = #tpu.dot_dimension_numbers<[2], [2], [1], [1], [0, 0, 0, 1, 1, 1], [0], [0]>} : vector<8x8x8xf32>, vector<8x8x8xf32>, vector<8x8x8xf32> -> vector<8x8x8xf32>
    "tpu.trace_stop"() : () -> ()
    %cst_7 = arith.constant dense<0xFF800000> : vector<8x8xf32>
    %41 = vector.multi_reduction <maximumf>, %40, %cst_7 [2] : vector<8x8x8xf32> to vector<8x8xf32>
    %42 = vector.shape_cast %41 : vector<8x8xf32> to vector<8x8x1xf32>
    %43 = vector.broadcast %42 : vector<8x8x1xf32> to vector<8x8x8xf32>
    %44 = arith.subf %40, %43 : vector<8x8x8xf32>
    %45 = math.exp %44 : vector<8x8x8xf32>
    %cst_8 = arith.constant dense<0.000000e+00> : vector<8x8xf32>
    %46 = vector.multi_reduction <add>, %45, %cst_8 [2] : vector<8x8x8xf32> to vector<8x8xf32>
    %47 = vector.shape_cast %46 : vector<8x8xf32> to vector<8x8x1xf32>
    %48 = tpu.reciprocal %47 : vector<8x8x1xf32> -> vector<8x8x1xf32>
    "tpu.trace_start"() <{level = 10 : i32, message = "bqk,bkd->bqd"}> : () -> ()
    %cst_9 = arith.constant dense<0.000000e+00> : vector<8x8x8xf32>
    %49 = tpu.matmul %45, %39, %cst_9 {dimension_numbers = #tpu.dot_dimension_numbers<[2], [1], [1], [2], [0, 0, 0, 1, 1, 2], [0], [0]>} : vector<8x8x8xf32>, vector<8x8x8xf32>, vector<8x8x8xf32> -> vector<8x8x8xf32>
    "tpu.trace_stop"() : () -> ()
    %50 = vector.broadcast %48 : vector<8x8x1xf32> to vector<8x8x8xf32>
    %51 = arith.mulf %49, %50 : vector<8x8x8xf32>
    %52 = vector.shape_cast %51 : vector<8x8x8xf32> to vector<4x16x8xf32>
    %53 = vector.extract_strided_slice %52 {offsets = [0, 0, 0], sizes = [1, 16, 8], strides = [1, 1, 1]} : vector<4x16x8xf32> to vector<1x16x8xf32>
    %54 = vector.shape_cast %53 : vector<1x16x8xf32> to vector<16x8xf32>
    %c0_10 = arith.constant 0 : index
    %c0_11 = arith.constant 0 : index
    %c0_12 = arith.constant 0 : index
    %55 = vector.load %arg4[%c0_10, %c0_11, %c0_12] : memref<4x8x32xf32, #tpu.memory_space<vmem>>, vector<1x8x32xf32>
    %56 = vector.shape_cast %55 : vector<1x8x32xf32> to vector<8x32xf32>
    %cst_13 = arith.constant dense<0.000000e+00> : vector<16x32xf32>
    %57 = tpu.matmul %54, %56, %cst_13 {dimension_numbers = #tpu.dot_dimension_numbers<[1], [0], [0], [1], [0, 0, 1, 1], [], []>} : vector<16x8xf32>, vector<8x32xf32>, vector<16x32xf32> -> vector<16x32xf32>
    %58 = vector.extract_strided_slice %52 {offsets = [1, 0, 0], sizes = [1, 16, 8], strides = [1, 1, 1]} : vector<4x16x8xf32> to vector<1x16x8xf32>
    %59 = vector.shape_cast %58 : vector<1x16x8xf32> to vector<16x8xf32>
    %c1 = arith.constant 1 : index
    %c0_14 = arith.constant 0 : index
    %c0_15 = arith.constant 0 : index
    %60 = vector.load %arg4[%c1, %c0_14, %c0_15] : memref<4x8x32xf32, #tpu.memory_space<vmem>>, vector<1x8x32xf32>
    %61 = vector.shape_cast %60 : vector<1x8x32xf32> to vector<8x32xf32>
    %cst_16 = arith.constant dense<0.000000e+00> : vector<16x32xf32>
    %62 = tpu.matmul %59, %61, %cst_16 {dimension_numbers = #tpu.dot_dimension_numbers<[1], [0], [0], [1], [0, 0, 1, 1], [], []>} : vector<16x8xf32>, vector<8x32xf32>, vector<16x32xf32> -> vector<16x32xf32>
    %63 = arith.addf %57, %62 : vector<16x32xf32>
    %64 = vector.extract_strided_slice %52 {offsets = [2, 0, 0], sizes = [1, 16, 8], strides = [1, 1, 1]} : vector<4x16x8xf32> to vector<1x16x8xf32>
    %65 = vector.shape_cast %64 : vector<1x16x8xf32> to vector<16x8xf32>
    %c2 = arith.constant 2 : index
    %c0_17 = arith.constant 0 : index
    %c0_18 = arith.constant 0 : index
    %66 = vector.load %arg4[%c2, %c0_17, %c0_18] : memref<4x8x32xf32, #tpu.memory_space<vmem>>, vector<1x8x32xf32>
    %67 = vector.shape_cast %66 : vector<1x8x32xf32> to vector<8x32xf32>
    %cst_19 = arith.constant dense<0.000000e+00> : vector<16x32xf32>
    %68 = tpu.matmul %65, %67, %cst_19 {dimension_numbers = #tpu.dot_dimension_numbers<[1], [0], [0], [1], [0, 0, 1, 1], [], []>} : vector<16x8xf32>, vector<8x32xf32>, vector<16x32xf32> -> vector<16x32xf32>
    %69 = arith.addf %63, %68 : vector<16x32xf32>
    %70 = vector.extract_strided_slice %52 {offsets = [3, 0, 0], sizes = [1, 16, 8], strides = [1, 1, 1]} : vector<4x16x8xf32> to vector<1x16x8xf32>
    %71 = vector.shape_cast %70 : vector<1x16x8xf32> to vector<16x8xf32>
    %c3 = arith.constant 3 : index
    %c0_20 = arith.constant 0 : index
    %c0_21 = arith.constant 0 : index
    %72 = vector.load %arg4[%c3, %c0_20, %c0_21] : memref<4x8x32xf32, #tpu.memory_space<vmem>>, vector<1x8x32xf32>
    %73 = vector.shape_cast %72 : vector<1x8x32xf32> to vector<8x32xf32>
    %cst_22 = arith.constant dense<0.000000e+00> : vector<16x32xf32>
    %74 = tpu.matmul %71, %73, %cst_22 {dimension_numbers = #tpu.dot_dimension_numbers<[1], [0], [0], [1], [0, 0, 1, 1], [], []>} : vector<16x8xf32>, vector<8x32xf32>, vector<16x32xf32> -> vector<16x32xf32>
    %75 = arith.addf %69, %74 : vector<16x32xf32>
    %76 = arith.addf %1, %75 : vector<16x32xf32>
    %c0_23 = arith.constant 0 : index
    %c0_24 = arith.constant 0 : index
    %77 = vector.load %arg5[%c0_23, %c0_24] : memref<1x32xf32, #tpu.memory_space<vmem>>, vector<1x32xf32>
    %78 = vector.broadcast %77 : vector<1x32xf32> to vector<16x32xf32>
    %79 = arith.addf %76, %78 : vector<16x32xf32>
    %c0_25 = arith.constant 0 : index
    %c0_26 = arith.constant 0 : index
    %80 = vector.load %arg6[%c0_25, %c0_26] : memref<32x32xf32, #tpu.memory_space<vmem>>, vector<32x32xf32>
    %cst_27 = arith.constant dense<0.000000e+00> : vector<16x32xf32>
    %81 = tpu.matmul %79, %80, %cst_27 {dimension_numbers = #tpu.dot_dimension_numbers<[1], [0], [0], [1], [0, 0, 1, 1], [], []>} : vector<16x32xf32>, vector<32x32xf32>, vector<16x32xf32> -> vector<16x32xf32>
    %c0_28 = arith.constant 0 : index
    %c0_29 = arith.constant 0 : index
    %82 = vector.load %arg7[%c0_28, %c0_29] : memref<1x32xf32, #tpu.memory_space<vmem>>, vector<1x32xf32>
    %83 = vector.broadcast %82 : vector<1x32xf32> to vector<16x32xf32>
    %84 = arith.addf %81, %83 : vector<16x32xf32>
    %85 = math.tanh %84 : vector<16x32xf32>
    %c0_30 = arith.constant 0 : index
    %c0_31 = arith.constant 0 : index
    %86 = vector.load %arg8[%c0_30, %c0_31] : memref<32x32xf32, #tpu.memory_space<vmem>>, vector<32x32xf32>
    %cst_32 = arith.constant dense<0.000000e+00> : vector<16x32xf32>
    %87 = tpu.matmul %85, %86, %cst_32 {dimension_numbers = #tpu.dot_dimension_numbers<[1], [0], [0], [1], [0, 0, 1, 1], [], []>} : vector<16x32xf32>, vector<32x32xf32>, vector<16x32xf32> -> vector<16x32xf32>
    %c0_33 = arith.constant 0 : index
    %c0_34 = arith.constant 0 : index
    %88 = vector.load %arg9[%c0_33, %c0_34] : memref<1x32xf32, #tpu.memory_space<vmem>>, vector<1x32xf32>
    %89 = vector.broadcast %88 : vector<1x32xf32> to vector<16x32xf32>
    %90 = arith.addf %87, %89 : vector<16x32xf32>
    %91 = arith.addf %79, %90 : vector<16x32xf32>
    %92 = vector.shape_cast %91 : vector<16x32xf32> to vector<2x8x32xf32>
    %c0_35 = arith.constant 0 : index
    %c0_36 = arith.constant 0 : index
    %c0_37 = arith.constant 0 : index
    %93 = vector.load %arg10[%c0_35, %c0_36, %c0_37] : memref<2x8x32xf32, #tpu.memory_space<vmem>>, vector<2x8x32xf32>
    tpu.vector_store %arg10[%c0_35, %c0_36, %c0_37], %92 {strides = array<i32>} : memref<2x8x32xf32, #tpu.memory_space<vmem>>, vector<2x8x32xf32>,
    return
  }
  func.func @transform_0(%arg0: i32) -> (i32, i32, i32) {
    %c0_i32 = arith.constant 0 : i32
    %c0_i32_0 = arith.constant 0 : i32
    %c0_i32_1 = arith.constant 0 : i32
    return %arg0, %c0_i32, %c0_i32_0 : i32, i32, i32
  }
  func.func @transform_1(%arg0: i32) -> (i32, i32) {
    %c0_i32 = arith.constant 0 : i32
    %c0_i32_0 = arith.constant 0 : i32
    %c0_i32_1 = arith.constant 0 : i32
    return %c0_i32, %c0_i32_0 : i32, i32
  }
  func.func @transform_2(%arg0: i32) -> (i32, i32) {
    %c0_i32 = arith.constant 0 : i32
    %c0_i32_0 = arith.constant 0 : i32
    %c0_i32_1 = arith.constant 0 : i32
    return %c0_i32, %c0_i32_0 : i32, i32
  }
  func.func @transform_3(%arg0: i32) -> (i32, i32, i32) {
    %c0_i32 = arith.constant 0 : i32
    %c0_i32_0 = arith.constant 0 : i32
    %c0_i32_1 = arith.constant 0 : i32
    %c0_i32_2 = arith.constant 0 : i32
    return %c0_i32, %c0_i32_0, %c0_i32_1 : i32, i32, i32
  }
  func.func @transform_4(%arg0: i32) -> (i32, i32) {
    %c0_i32 = arith.constant 0 : i32
    %c0_i32_0 = arith.constant 0 : i32
    %c0_i32_1 = arith.constant 0 : i32
    return %c0_i32, %c0_i32_0 : i32, i32
  }
  func.func @transform_5(%arg0: i32) -> (i32, i32) {
    %c0_i32 = arith.constant 0 : i32
    %c0_i32_0 = arith.constant 0 : i32
    %c0_i32_1 = arith.constant 0 : i32
    return %c0_i32, %c0_i32_0 : i32, i32
  }
  func.func @transform_6(%arg0: i32) -> (i32, i32) {
    %c0_i32 = arith.constant 0 : i32
    %c0_i32_0 = arith.constant 0 : i32
    %c0_i32_1 = arith.constant 0 : i32
    return %c0_i32, %c0_i32_0 : i32, i32
  }
  func.func @transform_7(%arg0: i32) -> (i32, i32) {
    %c0_i32 = arith.constant 0 : i32
    %c0_i32_0 = arith.constant 0 : i32
    %c0_i32_1 = arith.constant 0 : i32
    return %c0_i32, %c0_i32_0 : i32, i32
  }
  func.func @transform_8(%arg0: i32) -> (i32, i32) {
    %c0_i32 = arith.constant 0 : i32
    %c0_i32_0 = arith.constant 0 : i32
    %c0_i32_1 = arith.constant 0 : i32
    return %c0_i32, %c0_i32_0 : i32, i32
  }
  func.func @transform_9(%arg0: i32) -> (i32, i32, i32) {
    %c0_i32 = arith.constant 0 : i32
    %c0_i32_0 = arith.constant 0 : i32
    %c0_i32_1 = arith.constant 0 : i32
    return %arg0, %c0_i32, %c0_i32_0 : i32, i32, i32
  }
}

module attributes {stable_mosaic.version = 11 : i64} {
  func.func @_transformer_block_kernel(%arg0: i32, %arg1: memref<2x8x32xf32, #tpu.memory_space<vmem>>, %arg2: memref<32x96xf32, #tpu.memory_space<vmem>>, %arg3: memref<1x96xf32, #tpu.memory_space<vmem>>, %arg4: memref<4x8x32xf32, #tpu.memory_space<vmem>>, %arg5: memref<1x32xf32, #tpu.memory_space<vmem>>, %arg6: memref<32x32xf32, #tpu.memory_space<vmem>>, %arg7: memref<1x32xf32, #tpu.memory_space<vmem>>, %arg8: memref<32x32xf32, #tpu.memory_space<vmem>>, %arg9: memref<1x32xf32, #tpu.memory_space<vmem>>, %arg10: memref<2x8x32xf32, #tpu.memory_space<vmem>>) attributes {dimension_semantics = [#tpu.dimension_semantics<parallel>], iteration_bounds = array<i64: 1>, scalar_prefetch = 0 : i64, scratch_operands = 0 : i64, tpu.core_type = #tpu.core_type<tc>, window_params = [{transform_indices = @transform_0, window_bounds = array<i64: 2, 8, 32>}, {pipeline_mode = #tpu.pipeline_mode<synchronous>, transform_indices = @transform_1, window_bounds = array<i64: 32, 96>}, {pipeline_mode = #tpu.pipeline_mode<synchronous>, transform_indices = @transform_2, window_bounds = array<i64: 1, 96>}, {pipeline_mode = #tpu.pipeline_mode<synchronous>, transform_indices = @transform_3, window_bounds = array<i64: 4, 8, 32>}, {pipeline_mode = #tpu.pipeline_mode<synchronous>, transform_indices = @transform_4, window_bounds = array<i64: 1, 32>}, {pipeline_mode = #tpu.pipeline_mode<synchronous>, transform_indices = @transform_5, window_bounds = array<i64: 32, 32>}, {pipeline_mode = #tpu.pipeline_mode<synchronous>, transform_indices = @transform_6, window_bounds = array<i64: 1, 32>}, {pipeline_mode = #tpu.pipeline_mode<synchronous>, transform_indices = @transform_7, window_bounds = array<i64: 32, 32>}, {pipeline_mode = #tpu.pipeline_mode<synchronous>, transform_indices = @transform_8, window_bounds = array<i64: 1, 32>}, {transform_indices = @transform_9, window_bounds = array<i64: 2, 8, 32>}]} {
    %c0 = arith.constant 0 : index
    %c0_0 = arith.constant 0 : index
    %c0_1 = arith.constant 0 : index
    %0 = vector.load %arg1[%c0, %c0_0, %c0_1] : memref<2x8x32xf32, #tpu.memory_space<vmem>>, vector<2x8x32xf32>
    %1 = vector.shape_cast %0 : vector<2x8x32xf32> to vector<16x32xf32>
    %c0_2 = arith.constant 0 : index
    %c0_3 = arith.constant 0 : index
    %2 = vector.load %arg2[%c0_2, %c0_3] : memref<32x96xf32, #tpu.memory_space<vmem>>, vector<32x96xf32>
    %cst = arith.constant dense<0.000000e+00> : vector<16x96xf32>
    %3 = tpu.matmul %1, %2, %cst {dimension_numbers = #tpu.dot_dimension_numbers<[1], [0], [0], [1], [0, 0, 1, 1], [], []>} : vector<16x32xf32>, vector<32x96xf32>, vector<16x96xf32> -> vector<16x96xf32>
    %c0_4 = arith.constant 0 : index
    %c0_5 = arith.constant 0 : index
    %4 = vector.load %arg3[%c0_4, %c0_5] : memref<1x96xf32, #tpu.memory_space<vmem>>, vector<1x96xf32>
    %5 = vector.broadcast %4 : vector<1x96xf32> to vector<16x96xf32>
    %6 = arith.addf %3, %5 : vector<16x96xf32>
    %7 = vector.extract_strided_slice %6 {offsets = [0, 0], sizes = [16, 32], strides = [1, 1]} : vector<16x96xf32> to vector<16x32xf32>
    %8 = vector.extract_strided_slice %6 {offsets = [0, 32], sizes = [16, 32], strides = [1, 1]} : vector<16x96xf32> to vector<16x32xf32>
    %9 = vector.extract_strided_slice %6 {offsets = [0, 64], sizes = [16, 32], strides = [1, 1]} : vector<16x96xf32> to vector<16x32xf32>
    %10 = vector.extract_strided_slice %7 {offsets = [0, 0], sizes = [16, 8], strides = [1, 1]} : vector<16x32xf32> to vector<16x8xf32>
    %11 = vector.extract_strided_slice %7 {offsets = [0, 8], sizes = [16, 8], strides = [1, 1]} : vector<16x32xf32> to vector<16x8xf32>
    %12 = vector.extract_strided_slice %7 {offsets = [0, 16], sizes = [16, 8], strides = [1, 1]} : vector<16x32xf32> to vector<16x8xf32>
    %13 = vector.extract_strided_slice %7 {offsets = [0, 24], sizes = [16, 8], strides = [1, 1]} : vector<16x32xf32> to vector<16x8xf32>
    %14 = vector.shape_cast %10 : vector<16x8xf32> to vector<1x16x8xf32>
    %15 = vector.shape_cast %11 : vector<16x8xf32> to vector<1x16x8xf32>
    %16 = vector.shape_cast %12 : vector<16x8xf32> to vector<1x16x8xf32>
    %17 = vector.shape_cast %13 : vector<16x8xf32> to vector<1x16x8xf32>
    %18 = tpu.concatenate %14, %15, %16, %17 in 0 : vector<1x16x8xf32>, vector<1x16x8xf32>, vector<1x16x8xf32>, vector<1x16x8xf32> -> vector<4x16x8xf32>
    %19 = vector.shape_cast %18 : vector<4x16x8xf32> to vector<8x8x8xf32>
    %20 = vector.extract_strided_slice %8 {offsets = [0, 0], sizes = [16, 8], strides = [1, 1]} : vector<16x32xf32> to vector<16x8xf32>
    %21 = vector.extract_strided_slice %8 {offsets = [0, 8], sizes = [16, 8], strides = [1, 1]} : vector<16x32xf32> to vector<16x8xf32>
    %22 = vector.extract_strided_slice %8 {offsets = [0, 16], sizes = [16, 8], strides = [1, 1]} : vector<16x32xf32> to vector<16x8xf32>
    %23 = vector.extract_strided_slice %8 {offsets = [0, 24], sizes = [16, 8], strides = [1, 1]} : vector<16x32xf32> to vector<16x8xf32>
    %24 = vector.shape_cast %20 : vector<16x8xf32> to vector<1x16x8xf32>
    %25 = vector.shape_cast %21 : vector<16x8xf32> to vector<1x16x8xf32>
    %26 = vector.shape_cast %22 : vector<16x8xf32> to vector<1x16x8xf32>
    %27 = vector.shape_cast %23 : vector<16x8xf32> to vector<1x16x8xf32>
    %28 = tpu.concatenate %24, %25, %26, %27 in 0 : vector<1x16x8xf32>, vector<1x16x8xf32>, vector<1x16x8xf32>, vector<1x16x8xf32> -> vector<4x16x8xf32>
    %29 = vector.shape_cast %28 : vector<4x16x8xf32> to vector<8x8x8xf32>
    %30 = vector.extract_strided_slice %9 {offsets = [0, 0], sizes = [16, 8], strides = [1, 1]} : vector<16x32xf32> to vector<16x8xf32>
    %31 = vector.extract_strided_slice %9 {offsets = [0, 8], sizes = [16, 8], strides = [1, 1]} : vector<16x32xf32> to vector<16x8xf32>
    %32 = vector.extract_strided_slice %9 {offsets = [0, 16], sizes = [16, 8], strides = [1, 1]} : vector<16x32xf32> to vector<16x8xf32>
    %33 = vector.extract_strided_slice %9 {offsets = [0, 24], sizes = [16, 8], strides = [1, 1]} : vector<16x32xf32> to vector<16x8xf32>
    %34 = vector.shape_cast %30 : vector<16x8xf32> to vector<1x16x8xf32>
    %35 = vector.shape_cast %31 : vector<16x8xf32> to vector<1x16x8xf32>
    %36 = vector.shape_cast %32 : vector<16x8xf32> to vector<1x16x8xf32>
    %37 = vector.shape_cast %33 : vector<16x8xf32> to vector<1x16x8xf32>
    %38 = tpu.concatenate %34, %35, %36, %37 in 0 : vector<1x16x8xf32>, vector<1x16x8xf32>, vector<1x16x8xf32>, vector<1x16x8xf32> -> vector<4x16x8xf32>
    %39 = vector.shape_cast %38 : vector<4x16x8xf32> to vector<8x8x8xf32>
    "tpu.trace_start"() <{level = 10 : i32, message = "bqd,bkd->bqk"}> : () -> ()
    %cst_6 = arith.constant dense<0.000000e+00> : vector<8x8x8xf32>
    %40 = tpu.matmul %19, %29, %cst_6 {dimension_numbers = #tpu.dot_dimension_numbers<[2], [2], [1], [1], [0, 0, 0, 1, 1, 1], [0], [0]>} : vector<8x8x8xf32>, vector<8x8x8xf32>, vector<8x8x8xf32> -> vector<8x8x8xf32>
    "tpu.trace_stop"() : () -> ()
    %cst_7 = arith.constant dense<0xFF800000> : vector<8x8xf32>
    %41 = vector.multi_reduction <maximumf>, %40, %cst_7 [2] : vector<8x8x8xf32> to vector<8x8xf32>
    %42 = vector.shape_cast %41 : vector<8x8xf32> to vector<8x8x1xf32>
    %43 = vector.broadcast %42 : vector<8x8x1xf32> to vector<8x8x8xf32>
    %44 = arith.subf %40, %43 : vector<8x8x8xf32>
    %45 = math.exp %44 : vector<8x8x8xf32>
    %cst_8 = arith.constant dense<0.000000e+00> : vector<8x8xf32>
    %46 = vector.multi_reduction <add>, %45, %cst_8 [2] : vector<8x8x8xf32> to vector<8x8xf32>
    %47 = vector.shape_cast %46 : vector<8x8xf32> to vector<8x8x1xf32>
    %48 = tpu.reciprocal %47 : vector<8x8x1xf32> -> vector<8x8x1xf32>
    "tpu.trace_start"() <{level = 10 : i32, message = "bqk,bkd->bqd"}> : () -> ()
    %cst_9 = arith.constant dense<0.000000e+00> : vector<8x8x8xf32>
    %49 = tpu.matmul %45, %39, %cst_9 {dimension_numbers = #tpu.dot_dimension_numbers<[2], [1], [1], [2], [0, 0, 0, 1, 1, 2], [0], [0]>} : vector<8x8x8xf32>, vector<8x8x8xf32>, vector<8x8x8xf32> -> vector<8x8x8xf32>
    "tpu.trace_stop"() : () -> ()
    %50 = vector.broadcast %48 : vector<8x8x1xf32> to vector<8x8x8xf32>
    %51 = arith.mulf %49, %50 : vector<8x8x8xf32>
    %52 = vector.shape_cast %51 : vector<8x8x8xf32> to vector<4x16x8xf32>
    %53 = vector.extract_strided_slice %52 {offsets = [0, 0, 0], sizes = [1, 16, 8], strides = [1, 1, 1]} : vector<4x16x8xf32> to vector<1x16x8xf32>
    %54 = vector.shape_cast %53 : vector<1x16x8xf32> to vector<16x8xf32>
    %c0_10 = arith.constant 0 : index
    %c0_11 = arith.constant 0 : index
    %c0_12 = arith.constant 0 : index
    %55 = vector.load %arg4[%c0_10, %c0_11, %c0_12] : memref<4x8x32xf32, #tpu.memory_space<vmem>>, vector<1x8x32xf32>
    %56 = vector.shape_cast %55 : vector<1x8x32xf32> to vector<8x32xf32>
    %cst_13 = arith.constant dense<0.000000e+00> : vector<16x32xf32>
    %57 = tpu.matmul %54, %56, %cst_13 {dimension_numbers = #tpu.dot_dimension_numbers<[1], [0], [0], [1], [0, 0, 1, 1], [], []>} : vector<16x8xf32>, vector<8x32xf32>, vector<16x32xf32> -> vector<16x32xf32>
    %58 = vector.extract_strided_slice %52 {offsets = [1, 0, 0], sizes = [1, 16, 8], strides = [1, 1, 1]} : vector<4x16x8xf32> to vector<1x16x8xf32>
    %59 = vector.shape_cast %58 : vector<1x16x8xf32> to vector<16x8xf32>
    %c1 = arith.constant 1 : index
    %c0_14 = arith.constant 0 : index
    %c0_15 = arith.constant 0 : index
    %60 = vector.load %arg4[%c1, %c0_14, %c0_15] : memref<4x8x32xf32, #tpu.memory_space<vmem>>, vector<1x8x32xf32>
    %61 = vector.shape_cast %60 : vector<1x8x32xf32> to vector<8x32xf32>
    %cst_16 = arith.constant dense<0.000000e+00> : vector<16x32xf32>
    %62 = tpu.matmul %59, %61, %cst_16 {dimension_numbers = #tpu.dot_dimension_numbers<[1], [0], [0], [1], [0, 0, 1, 1], [], []>} : vector<16x8xf32>, vector<8x32xf32>, vector<16x32xf32> -> vector<16x32xf32>
    %63 = arith.addf %57, %62 : vector<16x32xf32>
    %64 = vector.extract_strided_slice %52 {offsets = [2, 0, 0], sizes = [1, 16, 8], strides = [1, 1, 1]} : vector<4x16x8xf32> to vector<1x16x8xf32>
    %65 = vector.shape_cast %64 : vector<1x16x8xf32> to vector<16x8xf32>
    %c2 = arith.constant 2 : index
    %c0_17 = arith.constant 0 : index
    %c0_18 = arith.constant 0 : index
    %66 = vector.load %arg4[%c2, %c0_17, %c0_18] : memref<4x8x32xf32, #tpu.memory_space<vmem>>, vector<1x8x32xf32>
    %67 = vector.shape_cast %66 : vector<1x8x32xf32> to vector<8x32xf32>
    %cst_19 = arith.constant dense<0.000000e+00> : vector<16x32xf32>
    %68 = tpu.matmul %65, %67, %cst_19 {dimension_numbers = #tpu.dot_dimension_numbers<[1], [0], [0], [1], [0, 0, 1, 1], [], []>} : vector<16x8xf32>, vector<8x32xf32>, vector<16x32xf32> -> vector<16x32xf32>
    %69 = arith.addf %63, %68 : vector<16x32xf32>
    %70 = vector.extract_strided_slice %52 {offsets = [3, 0, 0], sizes = [1, 16, 8], strides = [1, 1, 1]} : vector<4x16x8xf32> to vector<1x16x8xf32>
    %71 = vector.shape_cast %70 : vector<1x16x8xf32> to vector<16x8xf32>
    %c3 = arith.constant 3 : index
    %c0_20 = arith.constant 0 : index
    %c0_21 = arith.constant 0 : index
    %72 = vector.load %arg4[%c3, %c0_20, %c0_21] : memref<4x8x32xf32, #tpu.memory_space<vmem>>, vector<1x8x32xf32>
    %73 = vector.shape_cast %72 : vector<1x8x32xf32> to vector<8x32xf32>
    %cst_22 = arith.constant dense<0.000000e+00> : vector<16x32xf32>
    %74 = tpu.matmul %71, %73, %cst_22 {dimension_numbers = #tpu.dot_dimension_numbers<[1], [0], [0], [1], [0, 0, 1, 1], [], []>} : vector<16x8xf32>, vector<8x32xf32>, vector<16x32xf32> -> vector<16x32xf32>
    %75 = arith.addf %69, %74 : vector<16x32xf32>
    %76 = arith.addf %1, %75 : vector<16x32xf32>
    %c0_23 = arith.constant 0 : index
    %c0_24 = arith.constant 0 : index
    %77 = vector.load %arg5[%c0_23, %c0_24] : memref<1x32xf32, #tpu.memory_space<vmem>>, vector<1x32xf32>
    %78 = vector.broadcast %77 : vector<1x32xf32> to vector<16x32xf32>
    %79 = arith.addf %76, %78 : vector<16x32xf32>
    %c0_25 = arith.constant 0 : index
    %c0_26 = arith.constant 0 : index
    %80 = vector.load %arg6[%c0_25, %c0_26] : memref<32x32xf32, #tpu.memory_space<vmem>>, vector<32x32xf32>
    %cst_27 = arith.constant dense<0.000000e+00> : vector<16x32xf32>
    %81 = tpu.matmul %79, %80, %cst_27 {dimension_numbers = #tpu.dot_dimension_numbers<[1], [0], [0], [1], [0, 0, 1, 1], [], []>} : vector<16x32xf32>, vector<32x32xf32>, vector<16x32xf32> -> vector<16x32xf32>
    %c0_28 = arith.constant 0 : index
    %c0_29 = arith.constant 0 : index
    %82 = vector.load %arg7[%c0_28, %c0_29] : memref<1x32xf32, #tpu.memory_space<vmem>>, vector<1x32xf32>
    %83 = vector.broadcast %82 : vector<1x32xf32> to vector<16x32xf32>
    %84 = arith.addf %81, %83 : vector<16x32xf32>
    %85 = math.tanh %84 : vector<16x32xf32>
    %c0_30 = arith.constant 0 : index
    %c0_31 = arith.constant 0 : index
    %86 = vector.load %arg8[%c0_30, %c0_31] : memref<32x32xf32, #tpu.memory_space<vmem>>, vector<32x32xf32>
    %cst_32 = arith.constant dense<0.000000e+00> : vector<16x32xf32>
    %87 = tpu.matmul %85, %86, %cst_32 {dimension_numbers = #tpu.dot_dimension_numbers<[1], [0], [0], [1], [0, 0, 1, 1], [], []>} : vector<16x32xf32>, vector<32x32xf32>, vector<16x32xf32> -> vector<16x32xf32>
    %c0_33 = arith.constant 0 : index
    %c0_34 = arith.constant 0 : index
    %88 = vector.load %arg9[%c0_33, %c0_34] : memref<1x32xf32, #tpu.memory_space<vmem>>, vector<1x32xf32>
    %89 = vector.broadcast %88 : vector<1x32xf32> to vector<16x32xf32>
    %90 = arith.addf %87, %89 : vector<16x32xf32>
    %91 = arith.addf %79, %90 : vector<16x32xf32>
    %92 = vector.shape_cast %91 : vector<16x32xf32> to vector<2x8x32xf32>
    %c0_35 = arith.constant 0 : index
    %c0_36 = arith.constant 0 : index
    %c0_37 = arith.constant 0 : index
    %93 = vector.load %arg10[%c0_35, %c0_36, %c0_37] : memref<2x8x32xf32, #tpu.memory_space<vmem>>, vector<2x8x32xf32>
    tpu.vector_store %arg10[%c0_35, %c0_36, %c0_37], %92 {strides = array<i32>} : memref<2x8x32xf32, #tpu.memory_space<vmem>>, vector<2x8x32xf32>,
    return
  }
  func.func @transform_0(%arg0: i32) -> (i32, i32, i32) {
    %c0_i32 = arith.constant 0 : i32
    %c0_i32_0 = arith.constant 0 : i32
    %c0_i32_1 = arith.constant 0 : i32
    return %arg0, %c0_i32, %c0_i32_0 : i32, i32, i32
  }
  func.func @transform_1(%arg0: i32) -> (i32, i32) {
    %c0_i32 = arith.constant 0 : i32
    %c0_i32_0 = arith.constant 0 : i32
    %c0_i32_1 = arith.constant 0 : i32
    return %c0_i32, %c0_i32_0 : i32, i32
  }
  func.func @transform_2(%arg0: i32) -> (i32, i32) {
    %c0_i32 = arith.constant 0 : i32
    %c0_i32_0 = arith.constant 0 : i32
    %c0_i32_1 = arith.constant 0 : i32
    return %c0_i32, %c0_i32_0 : i32, i32
  }
  func.func @transform_3(%arg0: i32) -> (i32, i32, i32) {
    %c0_i32 = arith.constant 0 : i32
    %c0_i32_0 = arith.constant 0 : i32
    %c0_i32_1 = arith.constant 0 : i32
    %c0_i32_2 = arith.constant 0 : i32
    return %c0_i32, %c0_i32_0, %c0_i32_1 : i32, i32, i32
  }
  func.func @transform_4(%arg0: i32) -> (i32, i32) {
    %c0_i32 = arith.constant 0 : i32
    %c0_i32_0 = arith.constant 0 : i32
    %c0_i32_1 = arith.constant 0 : i32
    return %c0_i32, %c0_i32_0 : i32, i32
  }
  func.func @transform_5(%arg0: i32) -> (i32, i32) {
    %c0_i32 = arith.constant 0 : i32
    %c0_i32_0 = arith.constant 0 : i32
    %c0_i32_1 = arith.constant 0 : i32
    return %c0_i32, %c0_i32_0 : i32, i32
  }
  func.func @transform_6(%arg0: i32) -> (i32, i32) {
    %c0_i32 = arith.constant 0 : i32
    %c0_i32_0 = arith.constant 0 : i32
    %c0_i32_1 = arith.constant 0 : i32
    return %c0_i32, %c0_i32_0 : i32, i32
  }
  func.func @transform_7(%arg0: i32) -> (i32, i32) {
    %c0_i32 = arith.constant 0 : i32
    %c0_i32_0 = arith.constant 0 : i32
    %c0_i32_1 = arith.constant 0 : i32
    return %c0_i32, %c0_i32_0 : i32, i32
  }
  func.func @transform_8(%arg0: i32) -> (i32, i32) {
    %c0_i32 = arith.constant 0 : i32
    %c0_i32_0 = arith.constant 0 : i32
    %c0_i32_1 = arith.constant 0 : i32
    return %c0_i32, %c0_i32_0 : i32, i32
  }
  func.func @transform_9(%arg0: i32) -> (i32, i32, i32) {
    %c0_i32 = arith.constant 0 : i32
    %c0_i32_0 = arith.constant 0 : i32
    %c0_i32_1 = arith.constant 0 : i32
    return %arg0, %c0_i32, %c0_i32_0 : i32, i32, i32
  }
}

</mosaic_0001>

<bundles_post_ra>
// kernel: tpu_custom_call.1
= control target key start
LH: loop header
LB: loop body
LE: loop exit
PB: predicated region body
PF: predicated region fallthrough
CT: control target
= control target key end

     0   :  { %14 = vsyncpa [#allocation3], 0  ;;  %s2733_s0 = inlined_call_operand.hbm [shape: f32[2,8,32], index: 0, kind: input, shape index: {}]   ;;  %s2734_s1 = inlined_call_operand.hbm [shape: f32[32,96], index: 1, kind: input, shape index: {}]   ;;  %s2735_s2 = inlined_call_operand.vmem [shape: f32[1,96], index: 2, kind: input, shape index: {}]   ;;  %s2736_s3 = inlined_call_operand.hbm [shape: f32[4,8,32], index: 3, kind: input, shape index: {}]   ;;  %s2737_s4 = inlined_call_operand.vmem [shape: f32[1,32], index: 4, kind: input, shape index: {}]   ;;  %s2738_s5 = inlined_call_operand.hbm [shape: f32[32,32], index: 5, kind: input, shape index: {}]   ;;  %s2739_s6 = inlined_call_operand.vmem [shape: f32[1,32], index: 6, kind: input, shape index: {}]   ;;  %s2740_s7 = inlined_call_operand.hbm [shape: f32[32,32], index: 7, kind: input, shape index: {}]   ;;  %s2741_s8 = inlined_call_operand.vmem [shape: f32[1,32], index: 8, kind: input, shape index: {}]   ;;  %s2742_s9 = inlined_call_operand.hbm [shape: f32[2,8,32], index: 9, kind: output, shape index: {}]  }
   0x1   :  { %15 = vsyncpa [#allocation6], 0 }
   0x2   :  { %16 = vsyncpa [#allocation9], 0 }
   0x3   :  { %17 = vsyncpa [#allocation4], 0  ;;  %s2486_s30 = smov [#allocation5]   ;;  %s2487_s11 = smov [#allocation8]  }
   0x4   :  { %s35_s10 = sshll.u32 %s2486_s30, 4  ;;  %s63_s12 = sshll.u32 %s2487_s11, 4  ;;  %s36_s10 = int_to_ptr.vmem [resolvable:$true] %s35_s10  ;;  %s64_s12 = int_to_ptr.vmem [resolvable:$true] %s63_s12 }
   0x5   :  { %s2366_s13 = scalar_lea.vmem %s36_s10, 512  ;;  %p2371_p1 = scmp.lt.s32.totalorder %s36_s10, %s36_s10 }
   0x6   :  { %p2367_p0 = scmp.ne.s32.totalorder %s36_s10, %s2366_s13  ;;  %p2372_p2 = scmp.lt.s32.totalorder %s2366_s13, %s2366_s13 }
   0x8   :  { %p2373_p3 = por %p2372_p2, %p2371_p1 }
   0xa   :  { %p2374_p4 = pnand %p2373_p3, %p2367_p0 }
   0xc   :  { %2377 = shalt.err (!%p2374_p4)
}
   0xd   :  { %s2488_s14 = smov 128   ;;  %s2489_s15 = smov 8  }
   0xe   :  { %41 = dma.hbm_to_vmem [thread:$0]  %s2734_s1, 512, %s36_s10, [#allocation6], %s2488_s14, %s2488_s14, %s2489_s15  }
   0xf   :  { %s2386_s18 = scalar_lea.vmem %s64_s12, 512  ;;  %p2391_p6 = scmp.lt.s32.totalorder %s64_s12, %s64_s12 }
  0x10   :  { %p2387_p5 = scmp.ne.s32.totalorder %s64_s12, %s2386_s18  ;;  %p2392_p7 = scmp.lt.s32.totalorder %s2386_s18, %s2386_s18 }
  0x12   :  { %p2393_p8 = por %p2392_p7, %p2391_p6 }
  0x14   :  { %p2394_p9 = pnand %p2393_p8, %p2387_p5 }
  0x16   :  { %2397 = shalt.err (!%p2394_p9)
}
  0x17   :  { %69 = dma.hbm_to_vmem [thread:$0]  %s2738_s5, 512, %s64_s12, [#allocation9], %s2488_s14, %s2488_s14, %s2489_s15  }
  0x18   :  { %s2490_s21 = smov [#allocation2]   ;;  %s2491_s23 = smov [#allocation7]  }
  0x19   :  { %s23_s22 = sshll.u32 %s2490_s21, 4  ;;  %s49_s24 = sshll.u32 %s2491_s23, 4  ;;  %s24_s22 = int_to_ptr.vmem [resolvable:$true] %s23_s22  ;;  %s50_s24 = int_to_ptr.vmem [resolvable:$true] %s49_s24 }
  0x1a   :  { %s2406_s1 = scalar_lea.vmem %s24_s22, 256  ;;  %p2411_p11 = scmp.lt.s32.totalorder %s24_s22, %s24_s22 }
  0x1b   :  { %p2407_p10 = scmp.ne.s32.totalorder %s24_s22, %s2406_s1  ;;  %p2412_p12 = scmp.lt.s32.totalorder %s2406_s1, %s2406_s1 }
  0x1d   :  { %p2413_p13 = por %p2412_p12, %p2411_p11 }
  0x1f   :  { %p2414_p0 = pnand %p2413_p13, %p2407_p10 }
  0x21   :  { %2417 = shalt.err (!%p2414_p0)
}
  0x22   :  { %29 = dma.hbm_to_vmem [thread:$0]  %s2733_s0, 256, %s24_s22, [#allocation3], %s2488_s14, %s2488_s14, %s2489_s15  }
  0x23   :  { %s2426_s5 = scalar_lea.vmem %s50_s24, 512  ;;  %p2431_p2 = scmp.lt.s32.totalorder %s50_s24, %s50_s24 }
  0x24   :  { %p2427_p1 = scmp.ne.s32.totalorder %s50_s24, %s2426_s5  ;;  %p2432_p3 = scmp.lt.s32.totalorder %s2426_s5, %s2426_s5 }
  0x26   :  { %p2433_p4 = por %p2432_p3, %p2431_p2 }
  0x28   :  { %p2434_p5 = pnand %p2433_p4, %p2427_p1 }
  0x2a   :  { %2437 = shalt.err (!%p2434_p5)
}
  0x2b   :  { %55 = dma.hbm_to_vmem [thread:$0]  %s2736_s3, 512, %s50_s24, [#allocation6], %s2488_s14, %s2488_s14, %s2489_s15  }
  0x2c   :  { %s2492_s29 = smov [#allocation10]  }
  0x2d   :  { %s77_s30 = sshll.u32 %s2492_s29, 4  ;;  %s78_s30 = int_to_ptr.vmem [resolvable:$true] %s77_s30 }
  0x2e   :  { %s2446_s10 = scalar_lea.vmem %s78_s30, 512  ;;  %p2451_p7 = scmp.lt.s32.totalorder %s78_s30, %s78_s30 }
  0x2f   :  { %p2447_p6 = scmp.ne.s32.totalorder %s78_s30, %s2446_s10  ;;  %p2452_p8 = scmp.lt.s32.totalorder %s2446_s10, %s2446_s10 }
  0x31   :  { %p2453_p9 = por %p2452_p8, %p2451_p7 }
  0x33   :  { %p2454_p10 = pnand %p2453_p9, %p2447_p6 }
  0x35   :  { %2457 = shalt.err (!%p2454_p10)
}
  0x36   :  { %83 = dma.hbm_to_vmem [thread:$0]  %s2740_s7, 512, %s78_s30, [#allocation9], %s2488_s14, %s2488_s14, %s2489_s15  }
  0x37   :  { %2478 = dma.done.wait [#allocation3], 256  }
  0x38   :  { %2479 = vsyncadd [#allocation3], 4294967040 }
  0x39   :  { %2480 = dma.done.wait [#allocation6], 1024  }
  0x3a   :  { %2481 = vsyncadd [#allocation6], 4294966272 }
  0x3b   :  { %2482 = dma.done.wait [#allocation9], 1024  }
  0x3c   :  { %2483 = vsyncadd [#allocation9], 4294966272  ;;  %vm114_vm0 = vcmask 261120   ;;  %v106_v0 = vld [vmem:[#allocation5 + $0x18] sm:$0xff]  ;;  %v105_v1 = vld [vmem:[#allocation5 + $0x10] sm:$0xff]  ;;  %v2493_v7 = vmov 0.0  }
  0x3d   :  { %2174 = vmatprep.subr.mxu0 %v106_v0  ;;  %v2581_v2 = vld [vmem:[#allocation2] sm:$0xff]  ;;  %v104_v3 = vld [vmem:[#allocation5 + $0x8] sm:$0xff]  ;;  %v103_v4 = vld [vmem:[#allocation5] sm:$0xff]  ;;  %2185 = vmatprep.subr.mxu1 %v2493_v7  ;;  %s2494_s12 = smov 112   ;;  %s2495_s13 = smov 120   ;;  %vm2496_vm1 = vmmov 0  }
  0x3e   :  { %2175 = vmatpush3.msra.mxu0 %v106_v0  ;;  %2182 = vmatprep.mubr.msk.f32.mxu0 %vm114_vm0, %v2581_v2  ;;  %v2585_v5 = vld [vmem:[#allocation2 + $0x8] sm:$0xff]  ;;  %v2070_v8 = vld [vmem:[%s2735_s2] ss:$0 sm:$0xff]  ;;  %s2497_s16 = smov 104   ;;  %s2498_s2 = smov 96   ;;  %vm212_vm2 = vcmask 64512  }
  0x3f   :  { %2176 = vmatprep.subr.mxu0 %v105_v1  ;;  %2187 = vmatprep.mubr.msk.f32.mxu1 %vm2496_vm1, %v2493_v7  ;;  %s2499_s17 = smov 64  }
  0x40   :  { %2177 = vmatpush3.msra.mxu0 %v105_v1 }
  0x41   :  { %2178 = vmatprep.subr.mxu0 %v104_v3 }
  0x42   :  { %2179 = vmatpush3.msra.mxu0 %v104_v3 }
  0x43   :  { %2180 = vmatprep.subr.mxu0 %v103_v4 }
  0x44   :  { %2181 = vmatpush3.msra.mxu0 %v103_v4 }
  0x45   :  { %2183 = vmatmul.mubr.msk.f32.vlgmr.msra.gmra.mxu0 %vm114_vm0, %v2585_v5  ;;  %2195 = vmatprep.subr.mxu0 %v2493_v7 }
  0x46   :  { %2197 = vmatprep.mubr.msk.f32.mxu0 %vm2496_vm1, %v2493_v7 }
 0x105   :  { %v2184_v6 = vpop.f32.mrf.mxu0 }
 0x106   :  { %v193_v11 = vadd.f32 %v2184_v6, %v2070_v8 }
 0x107   :  { %v187_v9 = vpop.f32.mrf.mxu0 }
 0x108   :  { %v188_v10 = vadd.f32 %v2070_v8, %v187_v9 }
 0x10a   :  { %202 = vrot.lane.b32.xlu1 %v188_v10, %s2494_s12  ;;  %198 = vrot.lane.b32.xlu0 %v188_v10, %s2495_s13 }
 0x10e   :  { %204 = vrot.lane.b32.xlu1 %v193_v11, %s2494_s12  ;;  %200 = vrot.lane.b32.xlu0 %v193_v11, %s2495_s13 }
 0x112   :  { %208 = vrot.lane.b32.xlu1 %v193_v11, %s2497_s16  ;;  %206 = vrot.lane.b32.xlu0 %v188_v10, %s2497_s16 }
 0x116   :  { %287 = vrot.lane.b32.xlu1 %v193_v11, %s2498_s2  ;;  %210 = vrot.lane.b32.xlu0 %v188_v10, %s2498_s2 }
 0x17c   :  { %v203_v12 = vpop.permute.xlu1 %202  ;;  %v199_v13 = vpop.permute.xlu0 %198 }
 0x17d   :  { %363 = vrot.lane.b32.xlu0 %v199_v13, %s2498_s2 }
 0x180   :  { %v201_v14 = vpop.permute.xlu0 %200  ;;  %v205_v15 = vpop.permute.xlu1 %204 }
 0x181   :  { %515 = vrot.lane.b32.xlu0 %v203_v12, %s2498_s2  ;;  %439 = vrot.lane.b32.xlu1 %v201_v14, %s2498_s2 }
 0x184   :  { %v2598_v16 = vpop.permute.xlu0 %206  ;;  %v2601_v17 = vpop.permute.xlu1 %208 }
 0x185   :  { %591 = vrot.lane.b32.xlu1 %v205_v15, %s2498_s2  ;;  %667 = vrot.lane.b32.xlu0 %v2598_v16, %s2498_s2 }
 0x188   :  { %v211_v18 = vpop.permute.xlu0 %210  ;;  %v288_v19 = vpop.permute.xlu1 %287 }
 0x189   :  { %743 = vrot.lane.b32.xlu1 %v2601_v17, %s2498_s2  ;;  %975 = vrot.lane.b32.xlu0 %v193_v11, %s2499_s17 }
 0x18a   :  { %2186 = vmatpush3.xpose.msk.msra.mxu1 %vm212_vm2, %v211_v18 }
 0x18b   :  { %2190 = vmatprep.subr.mxu1 %v2493_v7 }
 0x18d   :  { %2188 = vmatmul.mubr.msk.f32.vlgmr.msra.gmra.mxu1 %vm212_vm2, %v188_v10  ;;  %899 = vrot.lane.b32.xlu1 %v188_v10, %s2499_s17 }
 0x18e   :  { %1203 = vrot.lane.b32.xlu0 %v203_v12, %s2499_s17  ;;  %2191 = vmatpush3.xpose.msk.msra.mxu1 %vm212_vm2, %v288_v19 }
 0x18f   :  { %2192 = vmatprep.mubr.msk.f32.mxu1 %vm2496_vm1, %v2493_v7  ;;  %2200 = vmatprep.subr.mxu1 %v2493_v7 }
 0x191   :  { %2193 = vmatmul.mubr.msk.f32.vlgmr.msra.gmra.mxu1 %vm212_vm2, %v193_v11  ;;  %1127 = vrot.lane.b32.xlu1 %v201_v14, %s2499_s17 }
 0x192   :  { %2202 = vmatprep.mubr.msk.f32.mxu1 %vm2496_vm1, %v2493_v7 }
 0x195   :  { %1279 = vrot.lane.b32.xlu1 %v205_v15, %s2499_s17 }
 0x199   :  { %1051 = vrot.lane.b32.xlu1 %v199_v13, %s2499_s17 }
 0x1ef   :  { %v364_v20 = vpop.permute.xlu0 %363 }
 0x1f0   :  { %2196 = vmatpush3.xpose.msk.msra.mxu0 %vm212_vm2, %v364_v20 }
 0x1f1   :  { %2205 = vmatprep.subr.mxu0 %v2493_v7 }
 0x1f3   :  { %v440_v21 = vpop.permute.xlu1 %439  ;;  %2198 = vmatmul.mubr.msk.f32.vlgmr.msra.gmra.mxu0 %vm212_vm2, %v199_v13  ;;  %v516_v22 = vpop.permute.xlu0 %515 }
 0x1f4   :  { %2201 = vmatpush3.xpose.msk.msra.mxu1 %vm212_vm2, %v440_v21  ;;  %2206 = vmatpush3.xpose.msk.msra.mxu0 %vm212_vm2, %v516_v22 }
 0x1f5   :  { %2207 = vmatprep.mubr.msk.f32.mxu0 %vm2496_vm1, %v2493_v7  ;;  %2210 = vmatprep.subr.mxu1 %v2493_v7 }
 0x1f6   :  { %2215 = vmatprep.subr.mxu0 %v2493_v7 }
 0x1f7   :  { %v592_v23 = vpop.permute.xlu1 %591  ;;  %2203 = vmatmul.mubr.msk.f32.vlgmr.msra.gmra.mxu1 %vm212_vm2, %v201_v14  ;;  %2208 = vmatmul.mubr.msk.f32.vlgmr.msra.gmra.mxu0 %vm212_vm2, %v203_v12  ;;  %v668_v24 = vpop.permute.xlu0 %667 }
 0x1f8   :  { %2211 = vmatpush3.xpose.msk.msra.mxu1 %vm212_vm2, %v592_v23  ;;  %2216 = vmatpush3.xpose.msk.msra.mxu0 %vm212_vm2, %v668_v24 }
 0x1f9   :  { %2212 = vmatprep.mubr.msk.f32.mxu1 %vm2496_vm1, %v2493_v7  ;;  %2217 = vmatprep.mubr.msk.f32.mxu0 %vm2496_vm1, %v2493_v7 }
 0x1fa   :  { %2220 = vmatprep.subr.mxu1 %v2493_v7  ;;  %2225 = vmatprep.subr.mxu0 %v2493_v7 }
 0x1fb   :  { %v744_v25 = vpop.permute.xlu1 %743  ;;  %2213 = vmatmul.mubr.msk.f32.vlgmr.msra.gmra.mxu1 %vm212_vm2, %v205_v15  ;;  %2218 = vmatmul.mubr.msk.f32.vlgmr.msra.gmra.mxu0 %vm212_vm2, %v2598_v16  ;;  %v976_v26 = vpop.permute.xlu0 %975 }
 0x1fc   :  { %2221 = vmatpush3.xpose.msk.msra.mxu1 %vm212_vm2, %v744_v25  ;;  %2222 = vmatprep.mubr.msk.f32.mxu1 %vm2496_vm1, %v2493_v7 }
 0x1fd   :  { %2230 = vmatprep.subr.mxu1 %v2493_v7  ;;  %2227 = vmatprep.mubr.msk.f32.mxu0 %vm2496_vm1, %v2493_v7 }
 0x1ff   :  { %v900_v27 = vpop.permute.xlu1 %899  ;;  %2223 = vmatmul.mubr.msk.f32.vlgmr.msra.gmra.mxu1 %vm212_vm2, %v2601_v17 }
 0x200   :  { %2226 = vmatpush3.msra.mxu0 %v900_v27  ;;  %2231 = vmatpush3.msra.mxu1 %v976_v26  ;;  %v1204_v54 = vpop.permute.xlu0 %1203 }
 0x201   :  { %2235 = vmatprep.subr.mxu0 %v2493_v7  ;;  %2232 = vmatprep.mubr.msk.f32.mxu1 %vm2496_vm1, %v2493_v7 }
 0x202   :  { %2240 = vmatprep.subr.mxu1 %v2493_v7 }
 0x203   :  { %v1128_v52 = vpop.permute.xlu1 %1127 }
 0x207   :  { %v1280_v53 = vpop.permute.xlu1 %1279 }
 0x20b   :  { %v1052_v55 = vpop.permute.xlu1 %1051 }
 0x24d   :  { %v283_v28 = vpop.f32.mrf.mxu1 }
 0x24e   :  { %v819_v29 = vsel %vm212_vm2, %v283_v28, -inf }
 0x24f   :  { %820 = vmax.xlane.f32.xlu0 %v819_v29  ;;  %v2189_v30 = vpop.f32.mrf.mxu1 }
 0x251   :  { %v359_v31 = vpop.f32.mrf.mxu1 }
 0x252   :  { %v822_v32 = vsel %vm212_vm2, %v359_v31, -inf }
 0x253   :  { %823 = vmax.xlane.f32.xlu1 %v822_v32  ;;  %v2194_v33 = vpop.f32.mrf.mxu1 }
 0x2b3   :  { %v2656_v34 = vpop.f32.mrf.mxu0 }
 0x2b4   :  { %v825_v44 = vsel %vm212_vm2, %v2656_v34, -inf }
 0x2b5   :  { %v2199_v35 = vpop.f32.mrf.mxu0 }
 0x2b6   :  { %v1515_v35 = vld [vmem:[#allocation7] sm:$0xff] }
 0x2b7   :  { %v511_v36 = vpop.f32.mrf.mxu1  ;;  %v587_v37 = vpop.f32.mrf.mxu0 }
 0x2b8   :  { %v828_v38 = vsel %vm212_vm2, %v511_v36, -inf  ;;  %v831_v39 = vsel %vm212_vm2, %v587_v37, -inf }
 0x2b9   :  { %829 = vmax.xlane.f32.xlu0 %v828_v38  ;;  %v2204_v40 = vpop.f32.mrf.mxu1  ;;  %832 = vmax.xlane.f32.xlu1 %v831_v39  ;;  %v2209_v41 = vpop.f32.mrf.mxu0  ;;  %v1517_v39 = vld [vmem:[#allocation7 + $0x8] sm:$0xff] }
 0x2ba   :  { %v1681_v41 = vld [vmem:[#allocation7 + $0x10] sm:$0xff] }
 0x2bb   :  { %v663_v42 = vpop.f32.mrf.mxu1  ;;  %v739_v43 = vpop.f32.mrf.mxu0 }
 0x2bc   :  { %v837_v45 = vsel %vm212_vm2, %v739_v43, -inf  ;;  %v834_v49 = vsel %vm212_vm2, %v663_v42, -inf }
 0x2bd   :  { %v2214_v46 = vpop.f32.mrf.mxu1  ;;  %826 = vmax.xlane.f32.xlu0 %v825_v44  ;;  %838 = vmax.xlane.f32.xlu1 %v837_v45  ;;  %v2219_v47 = vpop.f32.mrf.mxu0 }
 0x2bf   :  { %v815_v48 = vpop.f32.mrf.mxu1 }
 0x2c0   :  { %v840_v51 = vsel %vm212_vm2, %v815_v48, -inf }
 0x2c1   :  { %v2224_v50 = vpop.f32.mrf.mxu1  ;;  %835 = vmax.xlane.f32.xlu0 %v834_v49 }
 0x2c5   :  { %841 = vmax.xlane.f32.xlu0 %v840_v51 }
 0x2ce   :  { %1431 = vrot.lane.b32.xlu1 %v2601_v17, %s2499_s17 }
 0x2d8   :  { %v821_v56 = vpop.xlane.xlu0 %820 }
 0x2d9   :  { %v843_v57 = vsub.f32 %v283_v28, %v821_v56 }
 0x2db   :  { %v851_v58 = vmul.f32 1.442695, %v843_v57  ;;  %1355 = vrot.lane.b32.xlu0 %v2598_v16, %s2499_s17 }
 0x2dc   :  { %v824_v59 = vpop.xlane.xlu1 %823 }
 0x2dd   :  { %2322 = vpow2.f32 %v851_v58  ;;  %v844_v60 = vsub.f32 %v359_v31, %v824_v59 }
 0x2df   :  { %v853_v61 = vmul.f32 1.442695, %v844_v60 }
 0x2e1   :  { %2324 = vpow2.f32 %v853_v61 }
 0x2ea   :  { %v2323_v62 = vpop.eup %2322 }
 0x2eb   :  { %2228 = vmatmul.mubr.msk.f32.vlgmr.msra.gmra.mxu0 %vm212_vm2, %v2323_v62  ;;  %v867_v0 = vsel %vm212_vm2, %v2323_v62, 0.0 }
 0x2ec   :  { %2236 = vmatpush3.msra.mxu0 %v1052_v55  ;;  %2237 = vmatprep.mubr.msk.f32.mxu0 %vm2496_vm1, %v2493_v7 }
 0x2ed   :  { %2245 = vmatprep.subr.mxu0 %v2493_v7 }
 0x2ee   :  { %v2325_v63 = vpop.eup %2324 }
 0x2ef   :  { %2233 = vmatmul.mubr.msk.f32.vlgmr.msra.gmra.mxu1 %vm212_vm2, %v2325_v63  ;;  %v870_v1 = vsel %vm212_vm2, %v2325_v63, 0.0 }
 0x2f0   :  { %2241 = vmatpush3.msra.mxu1 %v1128_v52  ;;  %2242 = vmatprep.mubr.msk.f32.mxu1 %vm2496_vm1, %v2493_v7 }
 0x2f1   :  { %2250 = vmatprep.subr.mxu1 %v2493_v7 }
 0x2fa   :  { %868 = vadd.xlane.f32.xlu0 %v867_v0 }
 0x2fe   :  { %871 = vadd.xlane.f32.xlu0 %v870_v1 }
 0x342   :  { %v833_v3 = vpop.xlane.xlu1 %832  ;;  %v830_v4 = vpop.xlane.xlu0 %829 }
 0x343   :  { %v847_v6 = vsub.f32 %v587_v37, %v833_v3  ;;  %v846_v8 = vsub.f32 %v511_v36, %v830_v4 }
 0x345   :  { %v857_v9 = vmul.f32 1.442695, %v846_v8  ;;  %v859_v10 = vmul.f32 1.442695, %v847_v6 }
 0x346   :  { %v839_v11 = vpop.xlane.xlu1 %838  ;;  %v827_v12 = vpop.xlane.xlu0 %826 }
 0x347   :  { %v849_v13 = vsub.f32 %v739_v43, %v839_v11  ;;  %v845_v14 = vsub.f32 %v2656_v34, %v827_v12  ;;  %2326 = vpow2.f32 %v857_v9 }
 0x348   :  { %2328 = vpow2.f32 %v859_v10 }
 0x349   :  { %v855_v15 = vmul.f32 1.442695, %v845_v14  ;;  %v863_v16 = vmul.f32 1.442695, %v849_v13 }
 0x34a   :  { %v836_v17 = vpop.xlane.xlu0 %835  ;;  %v1432_v31 = vpop.permute.xlu1 %1431 }
 0x34b   :  { %v848_v18 = vsub.f32 %v663_v42, %v836_v17  ;;  %2330 = vpow2.f32 %v855_v15  ;;  %v1766_v42 = vld [vmem:[#allocation7 + $0x18] sm:$0xff] }
 0x34c   :  { %2332 = vpow2.f32 %v863_v16 }
 0x34d   :  { %v861_v19 = vmul.f32 1.442695, %v848_v18 }
 0x34e   :  { %v842_v20 = vpop.xlane.xlu0 %841 }
 0x34f   :  { %2334 = vpow2.f32 %v861_v19  ;;  %v850_v21 = vsub.f32 %v815_v48, %v842_v20  ;;  %v1864_v19 = vld [vmem:[#allocation8 + $0x18] sm:$0xff]  ;;  %v1863_v20 = vld [vmem:[#allocation8 + $0x10] sm:$0xff] }
 0x351   :  { %v865_v22 = vmul.f32 1.442695, %v850_v21  ;;  %v1862_v21 = vld [vmem:[#allocation8 + $0x8] sm:$0xff] }
 0x352   :  { %v1356_v33 = vpop.permute.xlu0 %1355 }
 0x353   :  { %2336 = vpow2.f32 %v865_v22  ;;  %v1861_v22 = vld [vmem:[#allocation8] sm:$0xff] }
 0x354   :  { %v2327_v23 = vpop.eup %2326 }
 0x355   :  { %2243 = vmatmul.mubr.msk.f32.vlgmr.msra.gmra.mxu1 %vm212_vm2, %v2327_v23  ;;  %v876_v24 = vsel %vm212_vm2, %v2327_v23, 0.0  ;;  %v2329_v25 = vpop.eup %2328 }
 0x356   :  { %2251 = vmatpush3.msra.mxu1 %v1280_v53  ;;  %877 = vadd.xlane.f32.xlu1 %v876_v24  ;;  %v879_v27 = vsel %vm212_vm2, %v2329_v25, 0.0 }
 0x357   :  { %2252 = vmatprep.mubr.msk.f32.mxu1 %vm2496_vm1, %v2493_v7  ;;  %2260 = vmatprep.subr.mxu1 %v2493_v7 }
 0x358   :  { %v2331_v26 = vpop.eup %2330 }
 0x359   :  { %2238 = vmatmul.mubr.msk.f32.vlgmr.msra.gmra.mxu0 %vm212_vm2, %v2331_v26  ;;  %v873_v28 = vsel %vm212_vm2, %v2331_v26, 0.0  ;;  %v2333_v29 = vpop.eup %2332 }
 0x35a   :  { %2246 = vmatpush3.msra.mxu0 %v1204_v54  ;;  %880 = vadd.xlane.f32.xlu1 %v879_v27  ;;  %v885_v34 = vsel %vm212_vm2, %v2333_v29, 0.0 }
 0x35b   :  { %874 = vadd.xlane.f32.xlu0 %v873_v28  ;;  %2247 = vmatprep.mubr.msk.f32.mxu0 %vm2496_vm1, %v2493_v7 }
 0x35c   :  { %v2335_v30 = vpop.eup %2334  ;;  %2255 = vmatprep.subr.mxu0 %v2493_v7 }
 0x35d   :  { %2253 = vmatmul.mubr.msk.f32.vlgmr.msra.gmra.mxu1 %vm212_vm2, %v2335_v30  ;;  %v882_v32 = vsel %vm212_vm2, %v2335_v30, 0.0  ;;  %2248 = vmatmul.mubr.msk.f32.vlgmr.msra.gmra.mxu0 %vm212_vm2, %v2329_v25 }
 0x35e   :  { %2261 = vmatpush3.msra.mxu1 %v1432_v31  ;;  %2256 = vmatpush3.msra.mxu0 %v1356_v33 }
 0x35f   :  { %886 = vadd.xlane.f32.xlu1 %v885_v34  ;;  %883 = vadd.xlane.f32.xlu0 %v882_v32 }
 0x360   :  { %v2337_v36 = vpop.eup %2336  ;;  %2257 = vmatprep.mubr.msk.f32.mxu0 %vm2496_vm1, %v2493_v7  ;;  %2262 = vmatprep.mubr.msk.f32.mxu1 %vm2496_vm1, %v2493_v7 }
 0x361   :  { %v888_v37 = vsel %vm212_vm2, %v2337_v36, 0.0  ;;  %2270 = vmatprep.subr.mxu1 %v1515_v35  ;;  %2258 = vmatmul.mubr.msk.f32.vlgmr.msra.gmra.mxu0 %vm212_vm2, %v2333_v29 }
 0x362   :  { %2263 = vmatmul.mubr.msk.f32.vlgmr.msra.gmra.mxu1 %vm212_vm2, %v2337_v36  ;;  %2265 = vmatprep.subr.mxu0 %v1517_v39 }
 0x363   :  { %2271 = vmatpush3.msra.mxu1 %v1515_v35  ;;  %889 = vadd.xlane.f32.xlu0 %v888_v37 }
 0x364   :  { %2266 = vmatpush3.msra.mxu0 %v1517_v39  ;;  %2280 = vmatprep.subr.mxu1 %v1766_v42 }
 0x365   :  { %2275 = vmatprep.subr.mxu0 %v1681_v41 }
 0x383   :  { %v869_v38 = vpop.xlane.xlu0 %868 }
 0x384   :  { %2338 = vrcp.f32 %v869_v38  ;;  %v2105_v38 = vld [vmem:[%s2737_s4] ss:$0 sm:$0xff] }
 0x387   :  { %v872_v40 = vpop.xlane.xlu0 %871 }
 0x388   :  { %2340 = vrcp.f32 %v872_v40 }
 0x391   :  { %v2339_v7 = vpop.eup %2338 }
 0x395   :  { %v2341_v46 = vpop.eup %2340 }
 0x3ab   :  { %v971_v43 = vpop.f32.mrf.mxu0 }
 0x3ac   :  { %v1507_v44 = vmul.f32 %v2339_v7, %v971_v43  ;;  %v1957_v7 = vld [vmem:[#allocation10 + $0x10] sm:$0xff]  ;;  %v1956_v43 = vld [vmem:[#allocation10 + $0x8] sm:$0xff] }
 0x3ad   :  { %v2229_v45 = vpop.f32.mrf.mxu0 }
 0x3ae   :  { %2272 = vmatprep.mubr.msk.f32.mxu1 %vm212_vm2, %v1507_v44 }
 0x3af   :  { %v1047_v47 = vpop.f32.mrf.mxu1 }
 0x3b0   :  { %v1508_v48 = vmul.f32 %v2341_v46, %v1047_v47 }
 0x3b1   :  { %v2234_v49 = vpop.f32.mrf.mxu1 }
 0x3b2   :  { %2273 = vmatmul.mubr.msk.f32.vlgmr.msra.gmra.mxu1 %vm212_vm2, %v1508_v48 }
 0x3b3   :  { %2281 = vmatpush3.msra.mxu1 %v1766_v42  ;;  %v1958_v42 = vld [vmem:[#allocation10 + $0x18] sm:$0xff] }
 0x3b4   :  { %2296 = vmatprep.subr.mxu1 %v1958_v42 }
 0x3df   :  { %v878_v50 = vpop.xlane.xlu1 %877 }
 0x3e3   :  { %v881_v52 = vpop.xlane.xlu1 %880 }
 0x3e4   :  { %v875_v51 = vpop.xlane.xlu0 %874 }
 0x3e5   :  { %2342 = vrcp.f32 %v875_v51 }
 0x3e6   :  { %2344 = vrcp.f32 %v878_v50  ;;  %v2109_v50 = vld [vmem:[%s2741_s8] ss:$0 sm:$0xff] }
 0x3e8   :  { %v884_v53 = vpop.xlane.xlu0 %883  ;;  %v887_v54 = vpop.xlane.xlu1 %886 }
 0x3e9   :  { %2346 = vrcp.f32 %v884_v53 }
 0x3ea   :  { %2348 = vrcp.f32 %v881_v52 }
 0x3eb   :  { %2350 = vrcp.f32 %v887_v54 }
 0x3ec   :  { %v890_v55 = vpop.xlane.xlu0 %889 }
 0x3ed   :  { %2352 = vrcp.f32 %v890_v55 }
 0x3f2   :  { %v2343_v58 = vpop.eup %2342 }
 0x3f3   :  { %v2345_v60 = vpop.eup %2344 }
 0x3f6   :  { %v2347_v0 = vpop.eup %2346 }
 0x3f7   :  { %v2349_v3 = vpop.eup %2348 }
 0x3f8   :  { %v2351_v11 = vpop.eup %2350 }
 0x3fa   :  { %v2353_v12 = vpop.eup %2352 }
 0x415   :  { %v1199_v56 = vpop.f32.mrf.mxu1 }
 0x416   :  { %v1510_v62 = vmul.f32 %v2345_v60, %v1199_v56 }
 0x417   :  { %v2244_v57 = vpop.f32.mrf.mxu1 }
 0x419   :  { %v1123_v59 = vpop.f32.mrf.mxu0 }
 0x41a   :  { %v1509_v61 = vmul.f32 %v2343_v58, %v1123_v59 }
 0x41b   :  { %v2239_v63 = vpop.f32.mrf.mxu0 }
 0x41c   :  { %2267 = vmatprep.mubr.msk.f32.mxu0 %vm212_vm2, %v1509_v61 }
 0x41d   :  { %v1351_v1 = vpop.f32.mrf.mxu1  ;;  %v1275_v4 = vpop.f32.mrf.mxu0  ;;  %2268 = vmatmul.mubr.msk.f32.vlgmr.msra.gmra.mxu0 %vm212_vm2, %v1510_v62 }
 0x41e   :  { %v1512_v6 = vmul.f32 %v2347_v0, %v1351_v1  ;;  %v1511_v8 = vmul.f32 %v2349_v3, %v1275_v4  ;;  %2276 = vmatpush3.msra.mxu0 %v1681_v41 }
 0x41f   :  { %v2254_v9 = vpop.f32.mrf.mxu1  ;;  %v2249_v10 = vpop.f32.mrf.mxu0  ;;  %2285 = vmatprep.subr.mxu0 %v1864_v19 }
 0x420   :  { %2277 = vmatprep.mubr.msk.f32.mxu0 %vm212_vm2, %v1511_v8 }
 0x421   :  { %v1427_v13 = vpop.f32.mrf.mxu0  ;;  %2278 = vmatmul.mubr.msk.f32.vlgmr.msra.gmra.mxu0 %vm212_vm2, %v1512_v6 }
 0x422   :  { %v1503_v14 = vpop.f32.mrf.mxu1  ;;  %v1513_v15 = vmul.f32 %v2351_v11, %v1427_v13  ;;  %2286 = vmatpush3.msra.mxu0 %v1864_v19 }
 0x423   :  { %v1514_v16 = vmul.f32 %v2353_v12, %v1503_v14  ;;  %v2259_v17 = vpop.f32.mrf.mxu0  ;;  %2287 = vmatprep.subr.mxu0 %v1863_v20 }
 0x424   :  { %v2264_v18 = vpop.f32.mrf.mxu1  ;;  %2282 = vmatprep.mubr.msk.f32.mxu1 %vm212_vm2, %v1513_v15  ;;  %2288 = vmatpush3.msra.mxu0 %v1863_v20 }
 0x425   :  { %2283 = vmatmul.mubr.msk.f32.vlgmr.msra.gmra.mxu1 %vm212_vm2, %v1514_v16  ;;  %2289 = vmatprep.subr.mxu0 %v1862_v21 }
 0x426   :  { %2290 = vmatpush3.msra.mxu0 %v1862_v21  ;;  %2297 = vmatpush3.msra.mxu1 %v1958_v42 }
 0x427   :  { %2291 = vmatprep.subr.mxu0 %v1861_v22  ;;  %2298 = vmatprep.subr.mxu1 %v1957_v7 }
 0x428   :  { %2292 = vmatpush3.msra.mxu0 %v1861_v22  ;;  %2299 = vmatpush3.msra.mxu1 %v1957_v7 }
 0x429   :  { %2300 = vmatprep.subr.mxu1 %v1956_v43 }
 0x42a   :  { %2301 = vmatpush3.msra.mxu1 %v1956_v43 }
 0x472   :  { %v2274_v24 = vpop.f32.mrf.mxu1 }
 0x474   :  { %v1671_v28 = vpop.f32.mrf.mxu1 }
 0x4dd   :  { %v2269_v23 = vpop.f32.mrf.mxu0 }
 0x4de   :  { %v1677_v27 = vadd.f32 %v2274_v24, %v2269_v23 }
 0x4df   :  { %v1590_v25 = vpop.f32.mrf.mxu0 }
 0x4e0   :  { %v1672_v30 = vadd.f32 %v1671_v28, %v1590_v25 }
 0x4e1   :  { %v2279_v26 = vpop.f32.mrf.mxu0 }
 0x4e2   :  { %v1764_v31 = vadd.f32 %v2279_v26, %v1677_v27 }
 0x4e3   :  { %v1754_v29 = vpop.f32.mrf.mxu0 }
 0x4e4   :  { %v1763_v33 = vadd.f32 %v1754_v29, %v1672_v30 }
 0x4e5   :  { %v2284_v32 = vpop.f32.mrf.mxu1 }
 0x4e6   :  { %v1849_v34 = vadd.f32 %v2284_v32, %v1764_v31 }
 0x4e7   :  { %v1839_v35 = vpop.f32.mrf.mxu1 }
 0x4e8   :  { %v1848_v36 = vadd.f32 %v1839_v35, %v1763_v33  ;;  %v1851_v37 = vadd.f32 %v1849_v34, %v2585_v5  ;;  %v1955_v5 = vld [vmem:[#allocation10] sm:$0xff] }
 0x4e9   :  { %2302 = vmatprep.subr.mxu1 %v1955_v5 }
 0x4ea   :  { %v1850_v39 = vadd.f32 %v1848_v36, %v2581_v2  ;;  %v1860_v41 = vadd.f32 %v2105_v38, %v1851_v37  ;;  %2303 = vmatpush3.msra.mxu1 %v1955_v5  ;;  %v2106_v2 = vld [vmem:[%s2739_s6] ss:$0 sm:$0xff]  ;;  %s2500_s6 = smov [#allocation11]  }
 0x4eb   :  { %s2056_s23 = sshll.u32 %s2500_s6, 4  ;;  %s2057_s23 = int_to_ptr.vmem [resolvable:$true] %s2056_s23 }
 0x4ec   :  { %v1859_v40 = vadd.f32 %v2105_v38, %v1850_v39  ;;  %s2458_s24 = scalar_lea.vmem %s2057_s23, 256  ;;  %p2463_p12 = scmp.lt.s32.totalorder %s2057_s23, %s2057_s23 }
 0x4ed   :  { %p2459_p11 = scmp.ne.s32.totalorder %s2057_s23, %s2458_s24  ;;  %p2464_p13 = scmp.lt.s32.totalorder %s2458_s24, %s2458_s24 }
 0x4ee   :  { %2293 = vmatprep.mubr.msk.f32.mxu0 %vm114_vm0, %v1859_v40 }
 0x4ef   :  { %2294 = vmatmul.mubr.msk.f32.vlgmr.msra.gmra.mxu0 %vm114_vm0, %v1860_v41  ;;  %p2465_p0 = por %p2464_p13, %p2463_p12 }
 0x4f1   :  { %p2466_p1 = pnand %p2465_p0, %p2459_p11 }
 0x5af   :  { %v2295_v44 = vpop.f32.mrf.mxu0 }
 0x5b0   :  { %v1950_v45 = vadd.f32 %v2295_v44, %v2106_v2 }
 0x5b1   :  { %v1944_v46 = vpop.f32.mrf.mxu0 }
 0x5b2   :  { %v1945_v47 = vadd.f32 %v2106_v2, %v1944_v46 }
 0x5b4   :  { %2354 = vtanh.f32 %v1945_v47 }
 0x5b5   :  { %2356 = vtanh.f32 %v1950_v45 }
 0x5c1   :  { %v2355_v48 = vpop.eup %2354 }
 0x5c2   :  { %v2357_v49 = vpop.eup %2356  ;;  %2304 = vmatprep.mubr.msk.f32.mxu1 %vm114_vm0, %v2355_v48 }
 0x5c3   :  { %2305 = vmatmul.mubr.msk.f32.vlgmr.msra.gmra.mxu1 %vm114_vm0, %v2357_v49 }
 0x683   :  { %v2306_v51 = vpop.f32.mrf.mxu1 }
 0x684   :  { %v2044_v52 = vadd.f32 %v2306_v51, %v2109_v50 }
 0x685   :  { %v2038_v53 = vpop.f32.mrf.mxu1 }
 0x686   :  { %v2048_v54 = vadd.f32 %v2044_v52, %v1860_v41  ;;  %v2039_v55 = vadd.f32 %v2109_v50, %v2038_v53 }
 0x688   :  { %2050 = vst.msk [vmem:[#allocation11 + $0x8] sm:$0xff] %vm114_vm0, %v2048_v54  ;;  %v2047_v56 = vadd.f32 %v2039_v55, %v1859_v40 }
 0x68a   :  { %2049 = vst.msk [vmem:[#allocation11] sm:$0xff] %vm114_vm0, %v2047_v56 }
 0x68b   :  { %2469 = shalt.err (!%p2466_p1)
}
 0x68c   :  { %2062 = dma.vmem_to_hbm [thread:$0]  %s2057_s23, 256, %s2742_s9, [#allocation4], %s2488_s14, %s2488_s14, %s2489_s15  }
 0x68d   :  { %2484 = dma.done.wait [#allocation4], 256  }
 0x68e   :  { %2485 = vsyncadd [#allocation4], 4294967040 }
 0x68f   :  { %2066 = vsyncpa [#allocation3], 1 }
 0x690   :  { %2067 = vsyncpa [#allocation6], 1 }
 0x691   :  { %2068 = vsyncpa [#allocation9], 1 }
 0x692   :  { %2069 = vsyncpa [#allocation4], 1 }

// kernel: tpu_custom_call.1
= control target key start
LH: loop header
LB: loop body
LE: loop exit
PB: predicated region body
PF: predicated region fallthrough
CT: control target
= control target key end

     0   :  { %14 = vsyncpa [#allocation3], 0  ;;  %s2733_s0 = inlined_call_operand.hbm [shape: f32[2,8,32], index: 0, kind: input, shape index: {}]   ;;  %s2734_s1 = inlined_call_operand.hbm [shape: f32[32,96], index: 1, kind: input, shape index: {}]   ;;  %s2735_s2 = inlined_call_operand.vmem [shape: f32[1,96], index: 2, kind: input, shape index: {}]   ;;  %s2736_s3 = inlined_call_operand.hbm [shape: f32[4,8,32], index: 3, kind: input, shape index: {}]   ;;  %s2737_s4 = inlined_call_operand.vmem [shape: f32[1,32], index: 4, kind: input, shape index: {}]   ;;  %s2738_s5 = inlined_call_operand.hbm [shape: f32[32,32], index: 5, kind: input, shape index: {}]   ;;  %s2739_s6 = inlined_call_operand.vmem [shape: f32[1,32], index: 6, kind: input, shape index: {}]   ;;  %s2740_s7 = inlined_call_operand.hbm [shape: f32[32,32], index: 7, kind: input, shape index: {}]   ;;  %s2741_s8 = inlined_call_operand.vmem [shape: f32[1,32], index: 8, kind: input, shape index: {}]   ;;  %s2742_s9 = inlined_call_operand.hbm [shape: f32[2,8,32], index: 9, kind: output, shape index: {}]  }
   0x1   :  { %15 = vsyncpa [#allocation6], 0 }
   0x2   :  { %16 = vsyncpa [#allocation9], 0 }
   0x3   :  { %17 = vsyncpa [#allocation4], 0  ;;  %s2486_s30 = smov [#allocation5]   ;;  %s2487_s11 = smov [#allocation8]  }
   0x4   :  { %s35_s10 = sshll.u32 %s2486_s30, 4  ;;  %s63_s12 = sshll.u32 %s2487_s11, 4  ;;  %s36_s10 = int_to_ptr.vmem [resolvable:$true] %s35_s10  ;;  %s64_s12 = int_to_ptr.vmem [resolvable:$true] %s63_s12 }
   0x5   :  { %s2366_s13 = scalar_lea.vmem %s36_s10, 512  ;;  %p2371_p1 = scmp.lt.s32.totalorder %s36_s10, %s36_s10 }
   0x6   :  { %p2367_p0 = scmp.ne.s32.totalorder %s36_s10, %s2366_s13  ;;  %p2372_p2 = scmp.lt.s32.totalorder %s2366_s13, %s2366_s13 }
   0x8   :  { %p2373_p3 = por %p2372_p2, %p2371_p1 }
   0xa   :  { %p2374_p4 = pnand %p2373_p3, %p2367_p0 }
   0xc   :  { %2377 = shalt.err (!%p2374_p4)
}
   0xd   :  { %s2488_s14 = smov 128   ;;  %s2489_s15 = smov 8  }
   0xe   :  { %41 = dma.hbm_to_vmem [thread:$0]  %s2734_s1, 512, %s36_s10, [#allocation6], %s2488_s14, %s2488_s14, %s2489_s15  }
   0xf   :  { %s2386_s18 = scalar_lea.vmem %s64_s12, 512  ;;  %p2391_p6 = scmp.lt.s32.totalorder %s64_s12, %s64_s12 }
  0x10   :  { %p2387_p5 = scmp.ne.s32.totalorder %s64_s12, %s2386_s18  ;;  %p2392_p7 = scmp.lt.s32.totalorder %s2386_s18, %s2386_s18 }
  0x12   :  { %p2393_p8 = por %p2392_p7, %p2391_p6 }
  0x14   :  { %p2394_p9 = pnand %p2393_p8, %p2387_p5 }
  0x16   :  { %2397 = shalt.err (!%p2394_p9)
}
  0x17   :  { %69 = dma.hbm_to_vmem [thread:$0]  %s2738_s5, 512, %s64_s12, [#allocation9], %s2488_s14, %s2488_s14, %s2489_s15  }
  0x18   :  { %s2490_s21 = smov [#allocation2]   ;;  %s2491_s23 = smov [#allocation7]  }
  0x19   :  { %s23_s22 = sshll.u32 %s2490_s21, 4  ;;  %s49_s24 = sshll.u32 %s2491_s23, 4  ;;  %s24_s22 = int_to_ptr.vmem [resolvable:$true] %s23_s22  ;;  %s50_s24 = int_to_ptr.vmem [resolvable:$true] %s49_s24 }
  0x1a   :  { %s2406_s1 = scalar_lea.vmem %s24_s22, 256  ;;  %p2411_p11 = scmp.lt.s32.totalorder %s24_s22, %s24_s22 }
  0x1b   :  { %p2407_p10 = scmp.ne.s32.totalorder %s24_s22, %s2406_s1  ;;  %p2412_p12 = scmp.lt.s32.totalorder %s2406_s1, %s2406_s1 }
  0x1d   :  { %p2413_p13 = por %p2412_p12, %p2411_p11 }
  0x1f   :  { %p2414_p0 = pnand %p2413_p13, %p2407_p10 }
  0x21   :  { %2417 = shalt.err (!%p2414_p0)
}
  0x22   :  { %29 = dma.hbm_to_vmem [thread:$0]  %s2733_s0, 256, %s24_s22, [#allocation3], %s2488_s14, %s2488_s14, %s2489_s15  }
  0x23   :  { %s2426_s5 = scalar_lea.vmem %s50_s24, 512  ;;  %p2431_p2 = scmp.lt.s32.totalorder %s50_s24, %s50_s24 }
  0x24   :  { %p2427_p1 = scmp.ne.s32.totalorder %s50_s24, %s2426_s5  ;;  %p2432_p3 = scmp.lt.s32.totalorder %s2426_s5, %s2426_s5 }
  0x26   :  { %p2433_p4 = por %p2432_p3, %p2431_p2 }
  0x28   :  { %p2434_p5 = pnand %p2433_p4, %p2427_p1 }
  0x2a   :  { %2437 = shalt.err (!%p2434_p5)
}
  0x2b   :  { %55 = dma.hbm_to_vmem [thread:$0]  %s2736_s3, 512, %s50_s24, [#allocation6], %s2488_s14, %s2488_s14, %s2489_s15  }
  0x2c   :  { %s2492_s29 = smov [#allocation10]  }
  0x2d   :  { %s77_s30 = sshll.u32 %s2492_s29, 4  ;;  %s78_s30 = int_to_ptr.vmem [resolvable:$true] %s77_s30 }
  0x2e   :  { %s2446_s10 = scalar_lea.vmem %s78_s30, 512  ;;  %p2451_p7 = scmp.lt.s32.totalorder %s78_s30, %s78_s30 }
  0x2f   :  { %p2447_p6 = scmp.ne.s32.totalorder %s78_s30, %s2446_s10  ;;  %p2452_p8 = scmp.lt.s32.totalorder %s2446_s10, %s2446_s10 }
  0x31   :  { %p2453_p9 = por %p2452_p8, %p2451_p7 }
  0x33   :  { %p2454_p10 = pnand %p2453_p9, %p2447_p6 }
  0x35   :  { %2457 = shalt.err (!%p2454_p10)
}
  0x36   :  { %83 = dma.hbm_to_vmem [thread:$0]  %s2740_s7, 512, %s78_s30, [#allocation9], %s2488_s14, %s2488_s14, %s2489_s15  }
  0x37   :  { %2478 = dma.done.wait [#allocation3], 256  }
  0x38   :  { %2479 = vsyncadd [#allocation3], 4294967040 }
  0x39   :  { %2480 = dma.done.wait [#allocation6], 1024  }
  0x3a   :  { %2481 = vsyncadd [#allocation6], 4294966272 }
  0x3b   :  { %2482 = dma.done.wait [#allocation9], 1024  }
  0x3c   :  { %2483 = vsyncadd [#allocation9], 4294966272  ;;  %vm114_vm0 = vcmask 261120   ;;  %v106_v0 = vld [vmem:[#allocation5 + $0x18] sm:$0xff]  ;;  %v105_v1 = vld [vmem:[#allocation5 + $0x10] sm:$0xff]  ;;  %v2493_v7 = vmov 0.0  }
  0x3d   :  { %2174 = vmatprep.subr.mxu0 %v106_v0  ;;  %v2581_v2 = vld [vmem:[#allocation2] sm:$0xff]  ;;  %v104_v3 = vld [vmem:[#allocation5 + $0x8] sm:$0xff]  ;;  %v103_v4 = vld [vmem:[#allocation5] sm:$0xff]  ;;  %2185 = vmatprep.subr.mxu1 %v2493_v7  ;;  %s2494_s12 = smov 112   ;;  %s2495_s13 = smov 120   ;;  %vm2496_vm1 = vmmov 0  }
  0x3e   :  { %2175 = vmatpush3.msra.mxu0 %v106_v0  ;;  %2182 = vmatprep.mubr.msk.f32.mxu0 %vm114_vm0, %v2581_v2  ;;  %v2585_v5 = vld [vmem:[#allocation2 + $0x8] sm:$0xff]  ;;  %v2070_v8 = vld [vmem:[%s2735_s2] ss:$0 sm:$0xff]  ;;  %s2497_s16 = smov 104   ;;  %s2498_s2 = smov 96   ;;  %vm212_vm2 = vcmask 64512  }
  0x3f   :  { %2176 = vmatprep.subr.mxu0 %v105_v1  ;;  %2187 = vmatprep.mubr.msk.f32.mxu1 %vm2496_vm1, %v2493_v7  ;;  %s2499_s17 = smov 64  }
  0x40   :  { %2177 = vmatpush3.msra.mxu0 %v105_v1 }
  0x41   :  { %2178 = vmatprep.subr.mxu0 %v104_v3 }
  0x42   :  { %2179 = vmatpush3.msra.mxu0 %v104_v3 }
  0x43   :  { %2180 = vmatprep.subr.mxu0 %v103_v4 }
  0x44   :  { %2181 = vmatpush3.msra.mxu0 %v103_v4 }
  0x45   :  { %2183 = vmatmul.mubr.msk.f32.vlgmr.msra.gmra.mxu0 %vm114_vm0, %v2585_v5  ;;  %2195 = vmatprep.subr.mxu0 %v2493_v7 }
  0x46   :  { %2197 = vmatprep.mubr.msk.f32.mxu0 %vm2496_vm1, %v2493_v7 }
 0x105   :  { %v2184_v6 = vpop.f32.mrf.mxu0 }
 0x106   :  { %v193_v11 = vadd.f32 %v2184_v6, %v2070_v8 }
 0x107   :  { %v187_v9 = vpop.f32.mrf.mxu0 }
 0x108   :  { %v188_v10 = vadd.f32 %v2070_v8, %v187_v9 }
 0x10a   :  { %202 = vrot.lane.b32.xlu1 %v188_v10, %s2494_s12  ;;  %198 = vrot.lane.b32.xlu0 %v188_v10, %s2495_s13 }
 0x10e   :  { %204 = vrot.lane.b32.xlu1 %v193_v11, %s2494_s12  ;;  %200 = vrot.lane.b32.xlu0 %v193_v11, %s2495_s13 }
 0x112   :  { %208 = vrot.lane.b32.xlu1 %v193_v11, %s2497_s16  ;;  %206 = vrot.lane.b32.xlu0 %v188_v10, %s2497_s16 }
 0x116   :  { %287 = vrot.lane.b32.xlu1 %v193_v11, %s2498_s2  ;;  %210 = vrot.lane.b32.xlu0 %v188_v10, %s2498_s2 }
 0x17c   :  { %v203_v12 = vpop.permute.xlu1 %202  ;;  %v199_v13 = vpop.permute.xlu0 %198 }
 0x17d   :  { %363 = vrot.lane.b32.xlu0 %v199_v13, %s2498_s2 }
 0x180   :  { %v201_v14 = vpop.permute.xlu0 %200  ;;  %v205_v15 = vpop.permute.xlu1 %204 }
 0x181   :  { %515 = vrot.lane.b32.xlu0 %v203_v12, %s2498_s2  ;;  %439 = vrot.lane.b32.xlu1 %v201_v14, %s2498_s2 }
 0x184   :  { %v2598_v16 = vpop.permute.xlu0 %206  ;;  %v2601_v17 = vpop.permute.xlu1 %208 }
 0x185   :  { %591 = vrot.lane.b32.xlu1 %v205_v15, %s2498_s2  ;;  %667 = vrot.lane.b32.xlu0 %v2598_v16, %s2498_s2 }
 0x188   :  { %v211_v18 = vpop.permute.xlu0 %210  ;;  %v288_v19 = vpop.permute.xlu1 %287 }
 0x189   :  { %743 = vrot.lane.b32.xlu1 %v2601_v17, %s2498_s2  ;;  %975 = vrot.lane.b32.xlu0 %v193_v11, %s2499_s17 }
 0x18a   :  { %2186 = vmatpush3.xpose.msk.msra.mxu1 %vm212_vm2, %v211_v18 }
 0x18b   :  { %2190 = vmatprep.subr.mxu1 %v2493_v7 }
 0x18d   :  { %2188 = vmatmul.mubr.msk.f32.vlgmr.msra.gmra.mxu1 %vm212_vm2, %v188_v10  ;;  %899 = vrot.lane.b32.xlu1 %v188_v10, %s2499_s17 }
 0x18e   :  { %1203 = vrot.lane.b32.xlu0 %v203_v12, %s2499_s17  ;;  %2191 = vmatpush3.xpose.msk.msra.mxu1 %vm212_vm2, %v288_v19 }
 0x18f   :  { %2192 = vmatprep.mubr.msk.f32.mxu1 %vm2496_vm1, %v2493_v7  ;;  %2200 = vmatprep.subr.mxu1 %v2493_v7 }
 0x191   :  { %2193 = vmatmul.mubr.msk.f32.vlgmr.msra.gmra.mxu1 %vm212_vm2, %v193_v11  ;;  %1127 = vrot.lane.b32.xlu1 %v201_v14, %s2499_s17 }
 0x192   :  { %2202 = vmatprep.mubr.msk.f32.mxu1 %vm2496_vm1, %v2493_v7 }
 0x195   :  { %1279 = vrot.lane.b32.xlu1 %v205_v15, %s2499_s17 }
 0x199   :  { %1051 = vrot.lane.b32.xlu1 %v199_v13, %s2499_s17 }
 0x1ef   :  { %v364_v20 = vpop.permute.xlu0 %363 }
 0x1f0   :  { %2196 = vmatpush3.xpose.msk.msra.mxu0 %vm212_vm2, %v364_v20 }
 0x1f1   :  { %2205 = vmatprep.subr.mxu0 %v2493_v7 }
 0x1f3   :  { %v440_v21 = vpop.permute.xlu1 %439  ;;  %2198 = vmatmul.mubr.msk.f32.vlgmr.msra.gmra.mxu0 %vm212_vm2, %v199_v13  ;;  %v516_v22 = vpop.permute.xlu0 %515 }
 0x1f4   :  { %2201 = vmatpush3.xpose.msk.msra.mxu1 %vm212_vm2, %v440_v21  ;;  %2206 = vmatpush3.xpose.msk.msra.mxu0 %vm212_vm2, %v516_v22 }
 0x1f5   :  { %2207 = vmatprep.mubr.msk.f32.mxu0 %vm2496_vm1, %v2493_v7  ;;  %2210 = vmatprep.subr.mxu1 %v2493_v7 }
 0x1f6   :  { %2215 = vmatprep.subr.mxu0 %v2493_v7 }
 0x1f7   :  { %v592_v23 = vpop.permute.xlu1 %591  ;;  %2203 = vmatmul.mubr.msk.f32.vlgmr.msra.gmra.mxu1 %vm212_vm2, %v201_v14  ;;  %2208 = vmatmul.mubr.msk.f32.vlgmr.msra.gmra.mxu0 %vm212_vm2, %v203_v12  ;;  %v668_v24 = vpop.permute.xlu0 %667 }
 0x1f8   :  { %2211 = vmatpush3.xpose.msk.msra.mxu1 %vm212_vm2, %v592_v23  ;;  %2216 = vmatpush3.xpose.msk.msra.mxu0 %vm212_vm2, %v668_v24 }
 0x1f9   :  { %2212 = vmatprep.mubr.msk.f32.mxu1 %vm2496_vm1, %v2493_v7  ;;  %2217 = vmatprep.mubr.msk.f32.mxu0 %vm2496_vm1, %v2493_v7 }
 0x1fa   :  { %2220 = vmatprep.subr.mxu1 %v2493_v7  ;;  %2225 = vmatprep.subr.mxu0 %v2493_v7 }
 0x1fb   :  { %v744_v25 = vpop.permute.xlu1 %743  ;;  %2213 = vmatmul.mubr.msk.f32.vlgmr.msra.gmra.mxu1 %vm212_vm2, %v205_v15  ;;  %2218 = vmatmul.mubr.msk.f32.vlgmr.msra.gmra.mxu0 %vm212_vm2, %v2598_v16  ;;  %v976_v26 = vpop.permute.xlu0 %975 }
 0x1fc   :  { %2221 = vmatpush3.xpose.msk.msra.mxu1 %vm212_vm2, %v744_v25  ;;  %2222 = vmatprep.mubr.msk.f32.mxu1 %vm2496_vm1, %v2493_v7 }
 0x1fd   :  { %2230 = vmatprep.subr.mxu1 %v2493_v7  ;;  %2227 = vmatprep.mubr.msk.f32.mxu0 %vm2496_vm1, %v2493_v7 }
 0x1ff   :  { %v900_v27 = vpop.permute.xlu1 %899  ;;  %2223 = vmatmul.mubr.msk.f32.vlgmr.msra.gmra.mxu1 %vm212_vm2, %v2601_v17 }
 0x200   :  { %2226 = vmatpush3.msra.mxu0 %v900_v27  ;;  %2231 = vmatpush3.msra.mxu1 %v976_v26  ;;  %v1204_v54 = vpop.permute.xlu0 %1203 }
 0x201   :  { %2235 = vmatprep.subr.mxu0 %v2493_v7  ;;  %2232 = vmatprep.mubr.msk.f32.mxu1 %vm2496_vm1, %v2493_v7 }
 0x202   :  { %2240 = vmatprep.subr.mxu1 %v2493_v7 }
 0x203   :  { %v1128_v52 = vpop.permute.xlu1 %1127 }
 0x207   :  { %v1280_v53 = vpop.permute.xlu1 %1279 }
 0x20b   :  { %v1052_v55 = vpop.permute.xlu1 %1051 }
 0x24d   :  { %v283_v28 = vpop.f32.mrf.mxu1 }
 0x24e   :  { %v819_v29 = vsel %vm212_vm2, %v283_v28, -inf }
 0x24f   :  { %820 = vmax.xlane.f32.xlu0 %v819_v29  ;;  %v2189_v30 = vpop.f32.mrf.mxu1 }
 0x251   :  { %v359_v31 = vpop.f32.mrf.mxu1 }
 0x252   :  { %v822_v32 = vsel %vm212_vm2, %v359_v31, -inf }
 0x253   :  { %823 = vmax.xlane.f32.xlu1 %v822_v32  ;;  %v2194_v33 = vpop.f32.mrf.mxu1 }
 0x2b3   :  { %v2656_v34 = vpop.f32.mrf.mxu0 }
 0x2b4   :  { %v825_v44 = vsel %vm212_vm2, %v2656_v34, -inf }
 0x2b5   :  { %v2199_v35 = vpop.f32.mrf.mxu0 }
 0x2b6   :  { %v1515_v35 = vld [vmem:[#allocation7] sm:$0xff] }
 0x2b7   :  { %v511_v36 = vpop.f32.mrf.mxu1  ;;  %v587_v37 = vpop.f32.mrf.mxu0 }
 0x2b8   :  { %v828_v38 = vsel %vm212_vm2, %v511_v36, -inf  ;;  %v831_v39 = vsel %vm212_vm2, %v587_v37, -inf }
 0x2b9   :  { %829 = vmax.xlane.f32.xlu0 %v828_v38  ;;  %v2204_v40 = vpop.f32.mrf.mxu1  ;;  %832 = vmax.xlane.f32.xlu1 %v831_v39  ;;  %v2209_v41 = vpop.f32.mrf.mxu0  ;;  %v1517_v39 = vld [vmem:[#allocation7 + $0x8] sm:$0xff] }
 0x2ba   :  { %v1681_v41 = vld [vmem:[#allocation7 + $0x10] sm:$0xff] }
 0x2bb   :  { %v663_v42 = vpop.f32.mrf.mxu1  ;;  %v739_v43 = vpop.f32.mrf.mxu0 }
 0x2bc   :  { %v837_v45 = vsel %vm212_vm2, %v739_v43, -inf  ;;  %v834_v49 = vsel %vm212_vm2, %v663_v42, -inf }
 0x2bd   :  { %v2214_v46 = vpop.f32.mrf.mxu1  ;;  %826 = vmax.xlane.f32.xlu0 %v825_v44  ;;  %838 = vmax.xlane.f32.xlu1 %v837_v45  ;;  %v2219_v47 = vpop.f32.mrf.mxu0 }
 0x2bf   :  { %v815_v48 = vpop.f32.mrf.mxu1 }
 0x2c0   :  { %v840_v51 = vsel %vm212_vm2, %v815_v48, -inf }
 0x2c1   :  { %v2224_v50 = vpop.f32.mrf.mxu1  ;;  %835 = vmax.xlane.f32.xlu0 %v834_v49 }
 0x2c5   :  { %841 = vmax.xlane.f32.xlu0 %v840_v51 }
 0x2ce   :  { %1431 = vrot.lane.b32.xlu1 %v2601_v17, %s2499_s17 }
 0x2d8   :  { %v821_v56 = vpop.xlane.xlu0 %820 }
 0x2d9   :  { %v843_v57 = vsub.f32 %v283_v28, %v821_v56 }
 0x2db   :  { %v851_v58 = vmul.f32 1.442695, %v843_v57  ;;  %1355 = vrot.lane.b32.xlu0 %v2598_v16, %s2499_s17 }
 0x2dc   :  { %v824_v59 = vpop.xlane.xlu1 %823 }
 0x2dd   :  { %2322 = vpow2.f32 %v851_v58  ;;  %v844_v60 = vsub.f32 %v359_v31, %v824_v59 }
 0x2df   :  { %v853_v61 = vmul.f32 1.442695, %v844_v60 }
 0x2e1   :  { %2324 = vpow2.f32 %v853_v61 }
 0x2ea   :  { %v2323_v62 = vpop.eup %2322 }
 0x2eb   :  { %2228 = vmatmul.mubr.msk.f32.vlgmr.msra.gmra.mxu0 %vm212_vm2, %v2323_v62  ;;  %v867_v0 = vsel %vm212_vm2, %v2323_v62, 0.0 }
 0x2ec   :  { %2236 = vmatpush3.msra.mxu0 %v1052_v55  ;;  %2237 = vmatprep.mubr.msk.f32.mxu0 %vm2496_vm1, %v2493_v7 }
 0x2ed   :  { %2245 = vmatprep.subr.mxu0 %v2493_v7 }
 0x2ee   :  { %v2325_v63 = vpop.eup %2324 }
 0x2ef   :  { %2233 = vmatmul.mubr.msk.f32.vlgmr.msra.gmra.mxu1 %vm212_vm2, %v2325_v63  ;;  %v870_v1 = vsel %vm212_vm2, %v2325_v63, 0.0 }
 0x2f0   :  { %2241 = vmatpush3.msra.mxu1 %v1128_v52  ;;  %2242 = vmatprep.mubr.msk.f32.mxu1 %vm2496_vm1, %v2493_v7 }
 0x2f1   :  { %2250 = vmatprep.subr.mxu1 %v2493_v7 }
 0x2fa   :  { %868 = vadd.xlane.f32.xlu0 %v867_v0 }
 0x2fe   :  { %871 = vadd.xlane.f32.xlu0 %v870_v1 }
 0x342   :  { %v833_v3 = vpop.xlane.xlu1 %832  ;;  %v830_v4 = vpop.xlane.xlu0 %829 }
 0x343   :  { %v847_v6 = vsub.f32 %v587_v37, %v833_v3  ;;  %v846_v8 = vsub.f32 %v511_v36, %v830_v4 }
 0x345   :  { %v857_v9 = vmul.f32 1.442695, %v846_v8  ;;  %v859_v10 = vmul.f32 1.442695, %v847_v6 }
 0x346   :  { %v839_v11 = vpop.xlane.xlu1 %838  ;;  %v827_v12 = vpop.xlane.xlu0 %826 }
 0x347   :  { %v849_v13 = vsub.f32 %v739_v43, %v839_v11  ;;  %v845_v14 = vsub.f32 %v2656_v34, %v827_v12  ;;  %2326 = vpow2.f32 %v857_v9 }
 0x348   :  { %2328 = vpow2.f32 %v859_v10 }
 0x349   :  { %v855_v15 = vmul.f32 1.442695, %v845_v14  ;;  %v863_v16 = vmul.f32 1.442695, %v849_v13 }
 0x34a   :  { %v836_v17 = vpop.xlane.xlu0 %835  ;;  %v1432_v31 = vpop.permute.xlu1 %1431 }
 0x34b   :  { %v848_v18 = vsub.f32 %v663_v42, %v836_v17  ;;  %2330 = vpow2.f32 %v855_v15  ;;  %v1766_v42 = vld [vmem:[#allocation7 + $0x18] sm:$0xff] }
 0x34c   :  { %2332 = vpow2.f32 %v863_v16 }
 0x34d   :  { %v861_v19 = vmul.f32 1.442695, %v848_v18 }
 0x34e   :  { %v842_v20 = vpop.xlane.xlu0 %841 }
 0x34f   :  { %2334 = vpow2.f32 %v861_v19  ;;  %v850_v21 = vsub.f32 %v815_v48, %v842_v20  ;;  %v1864_v19 = vld [vmem:[#allocation8 + $0x18] sm:$0xff]  ;;  %v1863_v20 = vld [vmem:[#allocation8 + $0x10] sm:$0xff] }
 0x351   :  { %v865_v22 = vmul.f32 1.442695, %v850_v21  ;;  %v1862_v21 = vld [vmem:[#allocation8 + $0x8] sm:$0xff] }
 0x352   :  { %v1356_v33 = vpop.permute.xlu0 %1355 }
 0x353   :  { %2336 = vpow2.f32 %v865_v22  ;;  %v1861_v22 = vld [vmem:[#allocation8] sm:$0xff] }
 0x354   :  { %v2327_v23 = vpop.eup %2326 }
 0x355   :  { %2243 = vmatmul.mubr.msk.f32.vlgmr.msra.gmra.mxu1 %vm212_vm2, %v2327_v23  ;;  %v876_v24 = vsel %vm212_vm2, %v2327_v23, 0.0  ;;  %v2329_v25 = vpop.eup %2328 }
 0x356   :  { %2251 = vmatpush3.msra.mxu1 %v1280_v53  ;;  %877 = vadd.xlane.f32.xlu1 %v876_v24  ;;  %v879_v27 = vsel %vm212_vm2, %v2329_v25, 0.0 }
 0x357   :  { %2252 = vmatprep.mubr.msk.f32.mxu1 %vm2496_vm1, %v2493_v7  ;;  %2260 = vmatprep.subr.mxu1 %v2493_v7 }
 0x358   :  { %v2331_v26 = vpop.eup %2330 }
 0x359   :  { %2238 = vmatmul.mubr.msk.f32.vlgmr.msra.gmra.mxu0 %vm212_vm2, %v2331_v26  ;;  %v873_v28 = vsel %vm212_vm2, %v2331_v26, 0.0  ;;  %v2333_v29 = vpop.eup %2332 }
 0x35a   :  { %2246 = vmatpush3.msra.mxu0 %v1204_v54  ;;  %880 = vadd.xlane.f32.xlu1 %v879_v27  ;;  %v885_v34 = vsel %vm212_vm2, %v2333_v29, 0.0 }
 0x35b   :  { %874 = vadd.xlane.f32.xlu0 %v873_v28  ;;  %2247 = vmatprep.mubr.msk.f32.mxu0 %vm2496_vm1, %v2493_v7 }
 0x35c   :  { %v2335_v30 = vpop.eup %2334  ;;  %2255 = vmatprep.subr.mxu0 %v2493_v7 }
 0x35d   :  { %2253 = vmatmul.mubr.msk.f32.vlgmr.msra.gmra.mxu1 %vm212_vm2, %v2335_v30  ;;  %v882_v32 = vsel %vm212_vm2, %v2335_v30, 0.0  ;;  %2248 = vmatmul.mubr.msk.f32.vlgmr.msra.gmra.mxu0 %vm212_vm2, %v2329_v25 }
 0x35e   :  { %2261 = vmatpush3.msra.mxu1 %v1432_v31  ;;  %2256 = vmatpush3.msra.mxu0 %v1356_v33 }
 0x35f   :  { %886 = vadd.xlane.f32.xlu1 %v885_v34  ;;  %883 = vadd.xlane.f32.xlu0 %v882_v32 }
 0x360   :  { %v2337_v36 = vpop.eup %2336  ;;  %2257 = vmatprep.mubr.msk.f32.mxu0 %vm2496_vm1, %v2493_v7  ;;  %2262 = vmatprep.mubr.msk.f32.mxu1 %vm2496_vm1, %v2493_v7 }
 0x361   :  { %v888_v37 = vsel %vm212_vm2, %v2337_v36, 0.0  ;;  %2270 = vmatprep.subr.mxu1 %v1515_v35  ;;  %2258 = vmatmul.mubr.msk.f32.vlgmr.msra.gmra.mxu0 %vm212_vm2, %v2333_v29 }
 0x362   :  { %2263 = vmatmul.mubr.msk.f32.vlgmr.msra.gmra.mxu1 %vm212_vm2, %v2337_v36  ;;  %2265 = vmatprep.subr.mxu0 %v1517_v39 }
 0x363   :  { %2271 = vmatpush3.msra.mxu1 %v1515_v35  ;;  %889 = vadd.xlane.f32.xlu0 %v888_v37 }
 0x364   :  { %2266 = vmatpush3.msra.mxu0 %v1517_v39  ;;  %2280 = vmatprep.subr.mxu1 %v1766_v42 }
 0x365   :  { %2275 = vmatprep.subr.mxu0 %v1681_v41 }
 0x383   :  { %v869_v38 = vpop.xlane.xlu0 %868 }
 0x384   :  { %2338 = vrcp.f32 %v869_v38  ;;  %v2105_v38 = vld [vmem:[%s2737_s4] ss:$0 sm:$0xff] }
 0x387   :  { %v872_v40 = vpop.xlane.xlu0 %871 }
 0x388   :  { %2340 = vrcp.f32 %v872_v40 }
 0x391   :  { %v2339_v7 = vpop.eup %2338 }
 0x395   :  { %v2341_v46 = vpop.eup %2340 }
 0x3ab   :  { %v971_v43 = vpop.f32.mrf.mxu0 }
 0x3ac   :  { %v1507_v44 = vmul.f32 %v2339_v7, %v971_v43  ;;  %v1957_v7 = vld [vmem:[#allocation10 + $0x10] sm:$0xff]  ;;  %v1956_v43 = vld [vmem:[#allocation10 + $0x8] sm:$0xff] }
 0x3ad   :  { %v2229_v45 = vpop.f32.mrf.mxu0 }
 0x3ae   :  { %2272 = vmatprep.mubr.msk.f32.mxu1 %vm212_vm2, %v1507_v44 }
 0x3af   :  { %v1047_v47 = vpop.f32.mrf.mxu1 }
 0x3b0   :  { %v1508_v48 = vmul.f32 %v2341_v46, %v1047_v47 }
 0x3b1   :  { %v2234_v49 = vpop.f32.mrf.mxu1 }
 0x3b2   :  { %2273 = vmatmul.mubr.msk.f32.vlgmr.msra.gmra.mxu1 %vm212_vm2, %v1508_v48 }
 0x3b3   :  { %2281 = vmatpush3.msra.mxu1 %v1766_v42  ;;  %v1958_v42 = vld [vmem:[#allocation10 + $0x18] sm:$0xff] }
 0x3b4   :  { %2296 = vmatprep.subr.mxu1 %v1958_v42 }
 0x3df   :  { %v878_v50 = vpop.xlane.xlu1 %877 }
 0x3e3   :  { %v881_v52 = vpop.xlane.xlu1 %880 }
 0x3e4   :  { %v875_v51 = vpop.xlane.xlu0 %874 }
 0x3e5   :  { %2342 = vrcp.f32 %v875_v51 }
 0x3e6   :  { %2344 = vrcp.f32 %v878_v50  ;;  %v2109_v50 = vld [vmem:[%s2741_s8] ss:$0 sm:$0xff] }
 0x3e8   :  { %v884_v53 = vpop.xlane.xlu0 %883  ;;  %v887_v54 = vpop.xlane.xlu1 %886 }
 0x3e9   :  { %2346 = vrcp.f32 %v884_v53 }
 0x3ea   :  { %2348 = vrcp.f32 %v881_v52 }
 0x3eb   :  { %2350 = vrcp.f32 %v887_v54 }
 0x3ec   :  { %v890_v55 = vpop.xlane.xlu0 %889 }
 0x3ed   :  { %2352 = vrcp.f32 %v890_v55 }
 0x3f2   :  { %v2343_v58 = vpop.eup %2342 }
 0x3f3   :  { %v2345_v60 = vpop.eup %2344 }
 0x3f6   :  { %v2347_v0 = vpop.eup %2346 }
 0x3f7   :  { %v2349_v3 = vpop.eup %2348 }
 0x3f8   :  { %v2351_v11 = vpop.eup %2350 }
 0x3fa   :  { %v2353_v12 = vpop.eup %2352 }
 0x415   :  { %v1199_v56 = vpop.f32.mrf.mxu1 }
 0x416   :  { %v1510_v62 = vmul.f32 %v2345_v60, %v1199_v56 }
 0x417   :  { %v2244_v57 = vpop.f32.mrf.mxu1 }
 0x419   :  { %v1123_v59 = vpop.f32.mrf.mxu0 }
 0x41a   :  { %v1509_v61 = vmul.f32 %v2343_v58, %v1123_v59 }
 0x41b   :  { %v2239_v63 = vpop.f32.mrf.mxu0 }
 0x41c   :  { %2267 = vmatprep.mubr.msk.f32.mxu0 %vm212_vm2, %v1509_v61 }
 0x41d   :  { %v1351_v1 = vpop.f32.mrf.mxu1  ;;  %v1275_v4 = vpop.f32.mrf.mxu0  ;;  %2268 = vmatmul.mubr.msk.f32.vlgmr.msra.gmra.mxu0 %vm212_vm2, %v1510_v62 }
 0x41e   :  { %v1512_v6 = vmul.f32 %v2347_v0, %v1351_v1  ;;  %v1511_v8 = vmul.f32 %v2349_v3, %v1275_v4  ;;  %2276 = vmatpush3.msra.mxu0 %v1681_v41 }
 0x41f   :  { %v2254_v9 = vpop.f32.mrf.mxu1  ;;  %v2249_v10 = vpop.f32.mrf.mxu0  ;;  %2285 = vmatprep.subr.mxu0 %v1864_v19 }
 0x420   :  { %2277 = vmatprep.mubr.msk.f32.mxu0 %vm212_vm2, %v1511_v8 }
 0x421   :  { %v1427_v13 = vpop.f32.mrf.mxu0  ;;  %2278 = vmatmul.mubr.msk.f32.vlgmr.msra.gmra.mxu0 %vm212_vm2, %v1512_v6 }
 0x422   :  { %v1503_v14 = vpop.f32.mrf.mxu1  ;;  %v1513_v15 = vmul.f32 %v2351_v11, %v1427_v13  ;;  %2286 = vmatpush3.msra.mxu0 %v1864_v19 }
 0x423   :  { %v1514_v16 = vmul.f32 %v2353_v12, %v1503_v14  ;;  %v2259_v17 = vpop.f32.mrf.mxu0  ;;  %2287 = vmatprep.subr.mxu0 %v1863_v20 }
 0x424   :  { %v2264_v18 = vpop.f32.mrf.mxu1  ;;  %2282 = vmatprep.mubr.msk.f32.mxu1 %vm212_vm2, %v1513_v15  ;;  %2288 = vmatpush3.msra.mxu0 %v1863_v20 }
 0x425   :  { %2283 = vmatmul.mubr.msk.f32.vlgmr.msra.gmra.mxu1 %vm212_vm2, %v1514_v16  ;;  %2289 = vmatprep.subr.mxu0 %v1862_v21 }
 0x426   :  { %2290 = vmatpush3.msra.mxu0 %v1862_v21  ;;  %2297 = vmatpush3.msra.mxu1 %v1958_v42 }
 0x427   :  { %2291 = vmatprep.subr.mxu0 %v1861_v22  ;;  %2298 = vmatprep.subr.mxu1 %v1957_v7 }
 0x428   :  { %2292 = vmatpush3.msra.mxu0 %v1861_v22  ;;  %2299 = vmatpush3.msra.mxu1 %v1957_v7 }
 0x429   :  { %2300 = vmatprep.subr.mxu1 %v1956_v43 }
 0x42a   :  { %2301 = vmatpush3.msra.mxu1 %v1956_v43 }
 0x472   :  { %v2274_v24 = vpop.f32.mrf.mxu1 }
 0x474   :  { %v1671_v28 = vpop.f32.mrf.mxu1 }
 0x4dd   :  { %v2269_v23 = vpop.f32.mrf.mxu0 }
 0x4de   :  { %v1677_v27 = vadd.f32 %v2274_v24, %v2269_v23 }
 0x4df   :  { %v1590_v25 = vpop.f32.mrf.mxu0 }
 0x4e0   :  { %v1672_v30 = vadd.f32 %v1671_v28, %v1590_v25 }
 0x4e1   :  { %v2279_v26 = vpop.f32.mrf.mxu0 }
 0x4e2   :  { %v1764_v31 = vadd.f32 %v2279_v26, %v1677_v27 }
 0x4e3   :  { %v1754_v29 = vpop.f32.mrf.mxu0 }
 0x4e4   :  { %v1763_v33 = vadd.f32 %v1754_v29, %v1672_v30 }
 0x4e5   :  { %v2284_v32 = vpop.f32.mrf.mxu1 }
 0x4e6   :  { %v1849_v34 = vadd.f32 %v2284_v32, %v1764_v31 }
 0x4e7   :  { %v1839_v35 = vpop.f32.mrf.mxu1 }
 0x4e8   :  { %v1848_v36 = vadd.f32 %v1839_v35, %v1763_v33  ;;  %v1851_v37 = vadd.f32 %v1849_v34, %v2585_v5  ;;  %v1955_v5 = vld [vmem:[#allocation10] sm:$0xff] }
 0x4e9   :  { %2302 = vmatprep.subr.mxu1 %v1955_v5 }
 0x4ea   :  { %v1850_v39 = vadd.f32 %v1848_v36, %v2581_v2  ;;  %v1860_v41 = vadd.f32 %v2105_v38, %v1851_v37  ;;  %2303 = vmatpush3.msra.mxu1 %v1955_v5  ;;  %v2106_v2 = vld [vmem:[%s2739_s6] ss:$0 sm:$0xff]  ;;  %s2500_s6 = smov [#allocation11]  }
 0x4eb   :  { %s2056_s23 = sshll.u32 %s2500_s6, 4  ;;  %s2057_s23 = int_to_ptr.vmem [resolvable:$true] %s2056_s23 }
 0x4ec   :  { %v1859_v40 = vadd.f32 %v2105_v38, %v1850_v39  ;;  %s2458_s24 = scalar_lea.vmem %s2057_s23, 256  ;;  %p2463_p12 = scmp.lt.s32.totalorder %s2057_s23, %s2057_s23 }
 0x4ed   :  { %p2459_p11 = scmp.ne.s32.totalorder %s2057_s23, %s2458_s24  ;;  %p2464_p13 = scmp.lt.s32.totalorder %s2458_s24, %s2458_s24 }
 0x4ee   :  { %2293 = vmatprep.mubr.msk.f32.mxu0 %vm114_vm0, %v1859_v40 }
 0x4ef   :  { %2294 = vmatmul.mubr.msk.f32.vlgmr.msra.gmra.mxu0 %vm114_vm0, %v1860_v41  ;;  %p2465_p0 = por %p2464_p13, %p2463_p12 }
 0x4f1   :  { %p2466_p1 = pnand %p2465_p0, %p2459_p11 }
 0x5af   :  { %v2295_v44 = vpop.f32.mrf.mxu0 }
 0x5b0   :  { %v1950_v45 = vadd.f32 %v2295_v44, %v2106_v2 }
 0x5b1   :  { %v1944_v46 = vpop.f32.mrf.mxu0 }
 0x5b2   :  { %v1945_v47 = vadd.f32 %v2106_v2, %v1944_v46 }
 0x5b4   :  { %2354 = vtanh.f32 %v1945_v47 }
 0x5b5   :  { %2356 = vtanh.f32 %v1950_v45 }
 0x5c1   :  { %v2355_v48 = vpop.eup %2354 }
 0x5c2   :  { %v2357_v49 = vpop.eup %2356  ;;  %2304 = vmatprep.mubr.msk.f32.mxu1 %vm114_vm0, %v2355_v48 }
 0x5c3   :  { %2305 = vmatmul.mubr.msk.f32.vlgmr.msra.gmra.mxu1 %vm114_vm0, %v2357_v49 }
 0x683   :  { %v2306_v51 = vpop.f32.mrf.mxu1 }
 0x684   :  { %v2044_v52 = vadd.f32 %v2306_v51, %v2109_v50 }
 0x685   :  { %v2038_v53 = vpop.f32.mrf.mxu1 }
 0x686   :  { %v2048_v54 = vadd.f32 %v2044_v52, %v1860_v41  ;;  %v2039_v55 = vadd.f32 %v2109_v50, %v2038_v53 }
 0x688   :  { %2050 = vst.msk [vmem:[#allocation11 + $0x8] sm:$0xff] %vm114_vm0, %v2048_v54  ;;  %v2047_v56 = vadd.f32 %v2039_v55, %v1859_v40 }
 0x68a   :  { %2049 = vst.msk [vmem:[#allocation11] sm:$0xff] %vm114_vm0, %v2047_v56 }
 0x68b   :  { %2469 = shalt.err (!%p2466_p1)
}
 0x68c   :  { %2062 = dma.vmem_to_hbm [thread:$0]  %s2057_s23, 256, %s2742_s9, [#allocation4], %s2488_s14, %s2488_s14, %s2489_s15  }
 0x68d   :  { %2484 = dma.done.wait [#allocation4], 256  }
 0x68e   :  { %2485 = vsyncadd [#allocation4], 4294967040 }
 0x68f   :  { %2066 = vsyncpa [#allocation3], 1 }
 0x690   :  { %2067 = vsyncpa [#allocation6], 1 }
 0x691   :  { %2068 = vsyncpa [#allocation9], 1 }
 0x692   :  { %2069 = vsyncpa [#allocation4], 1 }

</bundles_post_ra>
